<compile_context>
chip_gen: v6e
topology: v6e:2x2x1
jax: 0.10.0
libtpu: 0.0.40
codegen_flags: <defaults>
</compile_context>

<pallas_src>
import jax
import jax.numpy as jnp
from jax.experimental import pallas as pl
from jax.experimental.pallas import tpu as pltpu


# Padded layer widths (multiples of 128 on the lane axis).
_PAD = {784: 896, 256: 256, 64: 128, 32: 128}
D_IN, D_PAD = 784, 896


def _autoencoder_kernel(x_ref,
                        w1, b1, w2, b2, w3, b3,   # encoder 896->256->128->128
                        w4, b4, w5, b5, w6, b6,   # decoder 128->128->256->896
                        out_ref):
    def layer(h_bf16, w_ref, b_ref, last=False):
        y = jnp.dot(h_bf16, w_ref[...],
                    preferred_element_type=jnp.float32) + b_ref[...]
        if last:
            return jax.nn.sigmoid(y)                 # f32 output
        return jnp.maximum(y, 0.0).astype(jnp.bfloat16)

    h = x_ref[...]                                   # (TB, 896) bf16
    h = layer(h, w1, b1)
    h = layer(h, w2, b2)
    h = layer(h, w3, b3)
    h = layer(h, w4, b4)
    h = layer(h, w5, b5)
    h = layer(h, w6, b6, last=True)
    out_ref[...] = h.astype(out_ref.dtype)


def init_params(key):
    """Deterministic parameters matching nn.Linear (weight stored (out, in))."""
    dims = [(784, 256), (256, 64), (64, 32),     # encoder
            (32, 64), (64, 256), (256, 784)]     # decoder
    params = []
    for (fan_in, fan_out) in dims:
        key, kw, kb = jax.random.split(key, 3)
        bound = 1.0 / jnp.sqrt(fan_in)
        w = jax.random.uniform(kw, (fan_out, fan_in), jnp.float32, -bound, bound)
        b = jax.random.uniform(kb, (fan_out,), jnp.float32, -bound, bound)
        params.append((w, b))
    return params


def _round_up(n, m):
    return ((n + m - 1) // m) * m


def _pack_params(params):
    """Transpose to (in, out), zero-pad to lane-friendly widths, cast to bf16."""
    flat = []
    for (w, b) in params:
        fan_out, fan_in = w.shape
        in_p, out_p = _PAD[fan_in], _PAD[fan_out]
        wt = jnp.transpose(w)                                    # (in, out)
        wt = jnp.pad(wt, ((0, in_p - fan_in), (0, out_p - fan_out)))
        flat.append(wt.astype(jnp.bfloat16))
        bp = jnp.pad(b, (0, out_p - fan_out)).reshape(1, out_p)  # f32 bias
        flat.append(bp.astype(jnp.float32))
    return flat


def autoencoder_forward(x, params, *, tile_b=256):
    """x: (B, 1, 28, 28) float32 -> (B, 1, 28, 28) float32."""
    B = x.shape[0]
    x2 = x.reshape(B, D_IN).astype(jnp.float32)

    # Batch tile: multiple of 16 (bf16 sublane packing), capped at tile_b.
    TB = min(tile_b, _round_up(B, 16))
    Bp = _round_up(B, TB)

    # Zero-pad batch rows and feature dim 784 -> 896; cast activations to bf16.
    x2 = jnp.pad(x2, ((0, Bp - B), (0, D_PAD - D_IN))).astype(jnp.bfloat16)

    flat_args = _pack_params(params)

    grid = (Bp // TB,)
    x_spec = pl.BlockSpec((TB, D_PAD), lambda i: (i, 0))
    param_specs = [pl.BlockSpec(a.shape, lambda i: (0, 0)) for a in flat_args]
    out_spec = pl.BlockSpec((TB, D_PAD), lambda i: (i, 0))

    weight_bytes = sum(a.size * a.dtype.itemsize for a in flat_args)
    enc_macs = 784 * 256 + 256 * 64 + 64 * 32
    cost = pl.CostEstimate(
        flops=2 * Bp * 2 * enc_macs,                       # encoder + decoder
        transcendentals=Bp * D_IN,                         # final sigmoid
        bytes_accessed=Bp * D_PAD * 2 + Bp * D_PAD * 4 + weight_bytes,
    )

    out = pl.pallas_call(
        _autoencoder_kernel,
        out_shape=jax.ShapeDtypeStruct((Bp, D_PAD), jnp.float32),
        grid=grid,
        in_specs=[x_spec] + param_specs,
        out_specs=out_spec,
        compiler_params=pltpu.CompilerParams(
            dimension_semantics=("parallel",)),
        cost_estimate=cost,
    )(x2, *flat_args)

    return out[:B, :D_IN].reshape(B, 1, 28, 28)


def _reference_forward(x, params):
    """Pure-JAX reference mirroring the kernel's bf16-matmul / f32-acc math."""
    B = x.shape[0]
    h = x.reshape(B, D_IN).astype(jnp.float32)
    acts = [jax.nn.relu] * 5 + [jax.nn.sigmoid]
    for (w, b), act in zip(params, acts):
        y = jnp.dot(h.astype(jnp.bfloat16), w.T.astype(jnp.bfloat16),
                    preferred_element_type=jnp.float32) + b
        h = act(y)
    return h.reshape(B, 1, 28, 28)


if __name__ == "__main__":
    key = jax.random.PRNGKey(0)
    kx, kp = jax.random.split(key)

    B = 2
    x = jax.random.uniform(kx, (B, 1, 28, 28), jnp.float32)
    params = init_params(kp)

    out = autoencoder_forward(x, params)
    out = jax.block_until_ready(out)

    ref = _reference_forward(x, params)
    assert out.shape == (B, 1, 28, 28)
    assert jnp.all(jnp.isfinite(out))
    assert jnp.allclose(out, ref, atol=1e-2, rtol=1e-2)

    print("KERNEL_OK")
</pallas_src>

<mosaic_0001>
module attributes {stable_mosaic.version = 11 : i64} {
  func.func @_autoencoder_kernel(%arg0: i32, %arg1: memref<16x896xbf16, #tpu.memory_space<vmem>>, %arg2: memref<896x256xbf16, #tpu.memory_space<vmem>>, %arg3: memref<1x256xf32, #tpu.memory_space<vmem>>, %arg4: memref<256x128xbf16, #tpu.memory_space<vmem>>, %arg5: memref<1x128xf32, #tpu.memory_space<vmem>>, %arg6: memref<128x128xbf16, #tpu.memory_space<vmem>>, %arg7: memref<1x128xf32, #tpu.memory_space<vmem>>, %arg8: memref<128x128xbf16, #tpu.memory_space<vmem>>, %arg9: memref<1x128xf32, #tpu.memory_space<vmem>>, %arg10: memref<128x256xbf16, #tpu.memory_space<vmem>>, %arg11: memref<1x256xf32, #tpu.memory_space<vmem>>, %arg12: memref<256x896xbf16, #tpu.memory_space<vmem>>, %arg13: memref<1x896xf32, #tpu.memory_space<vmem>>, %arg14: memref<16x896xf32, #tpu.memory_space<vmem>>) attributes {dimension_semantics = [#tpu.dimension_semantics<parallel>], iteration_bounds = array<i64: 1>, scalar_prefetch = 0 : i64, scratch_operands = 0 : i64, tpu.core_type = #tpu.core_type<tc>, window_params = [{transform_indices = @transform_0, window_bounds = array<i64: 16, 896>}, {pipeline_mode = #tpu.pipeline_mode<synchronous>, transform_indices = @transform_1, window_bounds = array<i64: 896, 256>}, {pipeline_mode = #tpu.pipeline_mode<synchronous>, transform_indices = @transform_2, window_bounds = array<i64: 1, 256>}, {pipeline_mode = #tpu.pipeline_mode<synchronous>, transform_indices = @transform_3, window_bounds = array<i64: 256, 128>}, {pipeline_mode = #tpu.pipeline_mode<synchronous>, transform_indices = @transform_4, window_bounds = array<i64: 1, 128>}, {pipeline_mode = #tpu.pipeline_mode<synchronous>, transform_indices = @transform_5, window_bounds = array<i64: 128, 128>}, {pipeline_mode = #tpu.pipeline_mode<synchronous>, transform_indices = @transform_6, window_bounds = array<i64: 1, 128>}, {pipeline_mode = #tpu.pipeline_mode<synchronous>, transform_indices = @transform_7, window_bounds = array<i64: 128, 128>}, {pipeline_mode = #tpu.pipeline_mode<synchronous>, transform_indices = @transform_8, window_bounds = array<i64: 1, 128>}, {pipeline_mode = #tpu.pipeline_mode<synchronous>, transform_indices = @transform_9, window_bounds = array<i64: 128, 256>}, {pipeline_mode = #tpu.pipeline_mode<synchronous>, transform_indices = @transform_10, window_bounds = array<i64: 1, 256>}, {pipeline_mode = #tpu.pipeline_mode<synchronous>, transform_indices = @transform_11, window_bounds = array<i64: 256, 896>}, {pipeline_mode = #tpu.pipeline_mode<synchronous>, transform_indices = @transform_12, window_bounds = array<i64: 1, 896>}, {transform_indices = @transform_13, window_bounds = array<i64: 16, 896>}]} {
    %c0 = arith.constant 0 : index
    %c0_0 = arith.constant 0 : index
    %0 = vector.load %arg1[%c0, %c0_0] : memref<16x896xbf16, #tpu.memory_space<vmem>>, vector<16x896xbf16>
    %c0_1 = arith.constant 0 : index
    %c0_2 = arith.constant 0 : index
    %1 = vector.load %arg2[%c0_1, %c0_2] : memref<896x256xbf16, #tpu.memory_space<vmem>>, vector<896x256xbf16>
    %cst = arith.constant dense<0.000000e+00> : vector<16x256xf32>
    %2 = tpu.matmul %0, %1, %cst {dimension_numbers = #tpu.dot_dimension_numbers<[1], [0], [0], [1], [0, 0, 1, 1], [], []>} : vector<16x896xbf16>, vector<896x256xbf16>, vector<16x256xf32> -> vector<16x256xf32>
    %c0_3 = arith.constant 0 : index
    %c0_4 = arith.constant 0 : index
    %3 = vector.load %arg3[%c0_3, %c0_4] : memref<1x256xf32, #tpu.memory_space<vmem>>, vector<1x256xf32>
    %4 = vector.broadcast %3 : vector<1x256xf32> to vector<16x256xf32>
    %5 = arith.addf %2, %4 : vector<16x256xf32>
    %cst_5 = arith.constant 0.000000e+00 : f32
    %6 = vector.broadcast %cst_5 : f32 to vector<16x256xf32>
    %7 = arith.maximumf %5, %6 : vector<16x256xf32>
    %8 = arith.truncf %7 : vector<16x256xf32> to vector<16x256xbf16>
    %c0_6 = arith.constant 0 : index
    %c0_7 = arith.constant 0 : index
    %9 = vector.load %arg4[%c0_6, %c0_7] : memref<256x128xbf16, #tpu.memory_space<vmem>>, vector<256x128xbf16>
    %cst_8 = arith.constant dense<0.000000e+00> : vector<16x128xf32>
    %10 = tpu.matmul %8, %9, %cst_8 {dimension_numbers = #tpu.dot_dimension_numbers<[1], [0], [0], [1], [0, 0, 1, 1], [], []>} : vector<16x256xbf16>, vector<256x128xbf16>, vector<16x128xf32> -> vector<16x128xf32>
    %c0_9 = arith.constant 0 : index
    %c0_10 = arith.constant 0 : index
    %11 = vector.load %arg5[%c0_9, %c0_10] : memref<1x128xf32, #tpu.memory_space<vmem>>, vector<1x128xf32>
    %12 = vector.broadcast %11 : vector<1x128xf32> to vector<16x128xf32>
    %13 = arith.addf %10, %12 : vector<16x128xf32>
    %cst_11 = arith.constant 0.000000e+00 : f32
    %14 = vector.broadcast %cst_11 : f32 to vector<16x128xf32>
    %15 = arith.maximumf %13, %14 : vector<16x128xf32>
    %16 = arith.truncf %15 : vector<16x128xf32> to vector<16x128xbf16>
    %c0_12 = arith.constant 0 : index
    %c0_13 = arith.constant 0 : index
    %17 = vector.load %arg6[%c0_12, %c0_13] : memref<128x128xbf16, #tpu.memory_space<vmem>>, vector<128x128xbf16>
    %cst_14 = arith.constant dense<0.000000e+00> : vector<16x128xf32>
    %18 = tpu.matmul %16, %17, %cst_14 {dimension_numbers = #tpu.dot_dimension_numbers<[1], [0], [0], [1], [0, 0, 1, 1], [], []>} : vector<16x128xbf16>, vector<128x128xbf16>, vector<16x128xf32> -> vector<16x128xf32>
    %c0_15 = arith.constant 0 : index
    %c0_16 = arith.constant 0 : index
    %19 = vector.load %arg7[%c0_15, %c0_16] : memref<1x128xf32, #tpu.memory_space<vmem>>, vector<1x128xf32>
    %20 = vector.broadcast %19 : vector<1x128xf32> to vector<16x128xf32>
    %21 = arith.addf %18, %20 : vector<16x128xf32>
    %cst_17 = arith.constant 0.000000e+00 : f32
    %22 = vector.broadcast %cst_17 : f32 to vector<16x128xf32>
    %23 = arith.maximumf %21, %22 : vector<16x128xf32>
    %24 = arith.truncf %23 : vector<16x128xf32> to vector<16x128xbf16>
    %c0_18 = arith.constant 0 : index
    %c0_19 = arith.constant 0 : index
    %25 = vector.load %arg8[%c0_18, %c0_19] : memref<128x128xbf16, #tpu.memory_space<vmem>>, vector<128x128xbf16>
    %cst_20 = arith.constant dense<0.000000e+00> : vector<16x128xf32>
    %26 = tpu.matmul %24, %25, %cst_20 {dimension_numbers = #tpu.dot_dimension_numbers<[1], [0], [0], [1], [0, 0, 1, 1], [], []>} : vector<16x128xbf16>, vector<128x128xbf16>, vector<16x128xf32> -> vector<16x128xf32>
    %c0_21 = arith.constant 0 : index
    %c0_22 = arith.constant 0 : index
    %27 = vector.load %arg9[%c0_21, %c0_22] : memref<1x128xf32, #tpu.memory_space<vmem>>, vector<1x128xf32>
    %28 = vector.broadcast %27 : vector<1x128xf32> to vector<16x128xf32>
    %29 = arith.addf %26, %28 : vector<16x128xf32>
    %cst_23 = arith.constant 0.000000e+00 : f32
    %30 = vector.broadcast %cst_23 : f32 to vector<16x128xf32>
    %31 = arith.maximumf %29, %30 : vector<16x128xf32>
    %32 = arith.truncf %31 : vector<16x128xf32> to vector<16x128xbf16>
    %c0_24 = arith.constant 0 : index
    %c0_25 = arith.constant 0 : index
    %33 = vector.load %arg10[%c0_24, %c0_25] : memref<128x256xbf16, #tpu.memory_space<vmem>>, vector<128x256xbf16>
    %cst_26 = arith.constant dense<0.000000e+00> : vector<16x256xf32>
    %34 = tpu.matmul %32, %33, %cst_26 {dimension_numbers = #tpu.dot_dimension_numbers<[1], [0], [0], [1], [0, 0, 1, 1], [], []>} : vector<16x128xbf16>, vector<128x256xbf16>, vector<16x256xf32> -> vector<16x256xf32>
    %c0_27 = arith.constant 0 : index
    %c0_28 = arith.constant 0 : index
    %35 = vector.load %arg11[%c0_27, %c0_28] : memref<1x256xf32, #tpu.memory_space<vmem>>, vector<1x256xf32>
    %36 = vector.broadcast %35 : vector<1x256xf32> to vector<16x256xf32>
    %37 = arith.addf %34, %36 : vector<16x256xf32>
    %cst_29 = arith.constant 0.000000e+00 : f32
    %38 = vector.broadcast %cst_29 : f32 to vector<16x256xf32>
    %39 = arith.maximumf %37, %38 : vector<16x256xf32>
    %40 = arith.truncf %39 : vector<16x256xf32> to vector<16x256xbf16>
    %c0_30 = arith.constant 0 : index
    %c0_31 = arith.constant 0 : index
    %41 = vector.load %arg12[%c0_30, %c0_31] : memref<256x896xbf16, #tpu.memory_space<vmem>>, vector<256x896xbf16>
    %cst_32 = arith.constant dense<0.000000e+00> : vector<16x896xf32>
    %42 = tpu.matmul %40, %41, %cst_32 {dimension_numbers = #tpu.dot_dimension_numbers<[1], [0], [0], [1], [0, 0, 1, 1], [], []>} : vector<16x256xbf16>, vector<256x896xbf16>, vector<16x896xf32> -> vector<16x896xf32>
    %c0_33 = arith.constant 0 : index
    %c0_34 = arith.constant 0 : index
    %43 = vector.load %arg13[%c0_33, %c0_34] : memref<1x896xf32, #tpu.memory_space<vmem>>, vector<1x896xf32>
    %44 = vector.broadcast %43 : vector<1x896xf32> to vector<16x896xf32>
    %45 = arith.addf %42, %44 : vector<16x896xf32>
    %46 = arith.negf %45 : vector<16x896xf32>
    %47 = math.exp %46 : vector<16x896xf32>
    %cst_35 = arith.constant 1.000000e+00 : f32
    %48 = vector.broadcast %cst_35 : f32 to vector<16x896xf32>
    %49 = arith.addf %48, %47 : vector<16x896xf32>
    %50 = arith.divf %48, %49 : vector<16x896xf32>
    %c0_36 = arith.constant 0 : index
    %c0_37 = arith.constant 0 : index
    %51 = vector.load %arg14[%c0_36, %c0_37] : memref<16x896xf32, #tpu.memory_space<vmem>>, vector<16x896xf32>
    tpu.vector_store %arg14[%c0_36, %c0_37], %50 {strides = array<i32>} : memref<16x896xf32, #tpu.memory_space<vmem>>, vector<16x896xf32>,
    return
  }
  func.func @transform_0(%arg0: i32) -> (i32, i32) {
    %c0_i32 = arith.constant 0 : i32
    %c0_i32_0 = arith.constant 0 : i32
    return %arg0, %c0_i32 : i32, i32
  }
  func.func @transform_1(%arg0: i32) -> (i32, i32) {
    %c0_i32 = arith.constant 0 : i32
    %c0_i32_0 = arith.constant 0 : i32
    %c0_i32_1 = arith.constant 0 : i32
    return %c0_i32, %c0_i32_0 : i32, i32
  }
  func.func @transform_2(%arg0: i32) -> (i32, i32) {
    %c0_i32 = arith.constant 0 : i32
    %c0_i32_0 = arith.constant 0 : i32
    %c0_i32_1 = arith.constant 0 : i32
    return %c0_i32, %c0_i32_0 : i32, i32
  }
  func.func @transform_3(%arg0: i32) -> (i32, i32) {
    %c0_i32 = arith.constant 0 : i32
    %c0_i32_0 = arith.constant 0 : i32
    %c0_i32_1 = arith.constant 0 : i32
    return %c0_i32, %c0_i32_0 : i32, i32
  }
  func.func @transform_4(%arg0: i32) -> (i32, i32) {
    %c0_i32 = arith.constant 0 : i32
    %c0_i32_0 = arith.constant 0 : i32
    %c0_i32_1 = arith.constant 0 : i32
    return %c0_i32, %c0_i32_0 : i32, i32
  }
  func.func @transform_5(%arg0: i32) -> (i32, i32) {
    %c0_i32 = arith.constant 0 : i32
    %c0_i32_0 = arith.constant 0 : i32
    %c0_i32_1 = arith.constant 0 : i32
    return %c0_i32, %c0_i32_0 : i32, i32
  }
  func.func @transform_6(%arg0: i32) -> (i32, i32) {
    %c0_i32 = arith.constant 0 : i32
    %c0_i32_0 = arith.constant 0 : i32
    %c0_i32_1 = arith.constant 0 : i32
    return %c0_i32, %c0_i32_0 : i32, i32
  }
  func.func @transform_7(%arg0: i32) -> (i32, i32) {
    %c0_i32 = arith.constant 0 : i32
    %c0_i32_0 = arith.constant 0 : i32
    %c0_i32_1 = arith.constant 0 : i32
    return %c0_i32, %c0_i32_0 : i32, i32
  }
  func.func @transform_8(%arg0: i32) -> (i32, i32) {
    %c0_i32 = arith.constant 0 : i32
    %c0_i32_0 = arith.constant 0 : i32
    %c0_i32_1 = arith.constant 0 : i32
    return %c0_i32, %c0_i32_0 : i32, i32
  }
  func.func @transform_9(%arg0: i32) -> (i32, i32) {
    %c0_i32 = arith.constant 0 : i32
    %c0_i32_0 = arith.constant 0 : i32
    %c0_i32_1 = arith.constant 0 : i32
    return %c0_i32, %c0_i32_0 : i32, i32
  }
  func.func @transform_10(%arg0: i32) -> (i32, i32) {
    %c0_i32 = arith.constant 0 : i32
    %c0_i32_0 = arith.constant 0 : i32
    %c0_i32_1 = arith.constant 0 : i32
    return %c0_i32, %c0_i32_0 : i32, i32
  }
  func.func @transform_11(%arg0: i32) -> (i32, i32) {
    %c0_i32 = arith.constant 0 : i32
    %c0_i32_0 = arith.constant 0 : i32
    %c0_i32_1 = arith.constant 0 : i32
    return %c0_i32, %c0_i32_0 : i32, i32
  }
  func.func @transform_12(%arg0: i32) -> (i32, i32) {
    %c0_i32 = arith.constant 0 : i32
    %c0_i32_0 = arith.constant 0 : i32
    %c0_i32_1 = arith.constant 0 : i32
    return %c0_i32, %c0_i32_0 : i32, i32
  }
  func.func @transform_13(%arg0: i32) -> (i32, i32) {
    %c0_i32 = arith.constant 0 : i32
    %c0_i32_0 = arith.constant 0 : i32
    return %arg0, %c0_i32 : i32, i32
  }
}

</mosaic_0001>

<bundles_post_ra>
// kernel: tpu_custom_call.1
= control target key start
LH: loop header
LB: loop body
LE: loop exit
PB: predicated region body
PF: predicated region fallthrough
CT: control target
= control target key end

     0   :  { %18 = vsyncpa [#allocation3], 0  ;;  %s3879_s0 = inlined_call_operand.hbm [shape: bf16[16,896], index: 0, kind: input, shape index: {}]   ;;  %s3880_s1 = inlined_call_operand.hbm [shape: bf16[896,256], index: 1, kind: input, shape index: {}]   ;;  %s3881_s2 = inlined_call_operand.vmem [shape: f32[1,256], index: 2, kind: input, shape index: {}]   ;;  %s3882_s3 = inlined_call_operand.hbm [shape: bf16[256,128], index: 3, kind: input, shape index: {}]   ;;  %s3883_s4 = inlined_call_operand.vmem [shape: f32[1,128], index: 4, kind: input, shape index: {}]   ;;  %s3884_s5 = inlined_call_operand.hbm [shape: bf16[128,128], index: 5, kind: input, shape index: {}]   ;;  %s3885_s6 = inlined_call_operand.vmem [shape: f32[1,128], index: 6, kind: input, shape index: {}]   ;;  %s3886_s7 = inlined_call_operand.hbm [shape: bf16[128,128], index: 7, kind: input, shape index: {}]   ;;  %s3887_s8 = inlined_call_operand.vmem [shape: f32[1,128], index: 8, kind: input, shape index: {}]   ;;  %s3888_s9 = inlined_call_operand.hbm [shape: bf16[128,256], index: 9, kind: input, shape index: {}]   ;;  %s3889_s10 = inlined_call_operand.vmem [shape: f32[1,256], index: 10, kind: input, shape index: {}]   ;;  %s3890_s11 = inlined_call_operand.hbm [shape: bf16[256,896], index: 11, kind: input, shape index: {}]   ;;  %s3891_s12 = inlined_call_operand.vmem [shape: f32[1,896], index: 12, kind: input, shape index: {}]   ;;  %s3892_s13 = inlined_call_operand.hbm [shape: f32[16,896], index: 13, kind: output, shape index: {}]  }
   0x1   :  { %19 = vsyncpa [#allocation6], 0 }
   0x2   :  { %20 = vsyncpa [#allocation9], 0 }
   0x3   :  { %21 = vsyncpa [#allocation12], 0 }
   0x4   :  { %22 = vsyncpa [#allocation4], 0  ;;  %s3679_s25 = smov [#allocation5]  }
   0x5   :  { %s40_s26 = sshll.u32 %s3679_s25, 4  ;;  %s41_s26 = int_to_ptr.vmem [resolvable:$true] %s40_s26 }
   0x6   :  { %s3517_s27 = scalar_lea.vmem %s41_s26, 14336  ;;  %p3522_p1 = scmp.lt.s32.totalorder %s41_s26, %s41_s26 }
   0x7   :  { %p3518_p0 = scmp.ne.s32.totalorder %s41_s26, %s3517_s27  ;;  %p3523_p2 = scmp.lt.s32.totalorder %s3517_s27, %s3517_s27 }
   0x9   :  { %p3524_p3 = por %p3523_p2, %p3522_p1 }
   0xb   :  { %p3525_p4 = pnand %p3524_p3, %p3518_p0 }
   0xd   :  { %3528 = shalt.err (!%p3525_p4)
}
   0xe   :  { %s3680_s28 = smov 128   ;;  %s3681_s29 = smov 8  }
   0xf   :  { %46 = dma.hbm_to_vmem [thread:$0]  %s3880_s1, 14336, %s41_s26, [#allocation6], %s3680_s28, %s3680_s28, %s3681_s29  }
  0x10   :  { %s3682_s15 = smov [#allocation8]   ;;  %s3683_s17 = smov [#allocation11]  }
  0x11   :  { %s68_s16 = sshll.u32 %s3682_s15, 4  ;;  %s96_s18 = sshll.u32 %s3683_s17, 4  ;;  %s69_s16 = int_to_ptr.vmem [resolvable:$true] %s68_s16  ;;  %s97_s18 = int_to_ptr.vmem [resolvable:$true] %s96_s18 }
  0x12   :  { %s3537_s19 = scalar_lea.vmem %s69_s16, 1024  ;;  %p3542_p6 = scmp.lt.s32.totalorder %s69_s16, %s69_s16 }
  0x13   :  { %p3538_p5 = scmp.ne.s32.totalorder %s69_s16, %s3537_s19  ;;  %p3543_p7 = scmp.lt.s32.totalorder %s3537_s19, %s3537_s19 }
  0x15   :  { %p3544_p8 = por %p3543_p7, %p3542_p6 }
  0x17   :  { %p3545_p9 = pnand %p3544_p8, %p3538_p5 }
  0x19   :  { %3548 = shalt.err (!%p3545_p9)
}
  0x1a   :  { %s3684_s20 = smov 64   ;;  %s3685_s21 = smov 4  }
  0x1b   :  { %74 = dma.hbm_to_vmem [thread:$0]  %s3884_s5, 1024, %s69_s16, [#allocation9], %s3684_s20, %s3684_s20, %s3685_s21  }
  0x1c   :  { %s3557_s1 = scalar_lea.vmem %s97_s18, 2048  ;;  %p3562_p11 = scmp.lt.s32.totalorder %s97_s18, %s97_s18 }
  0x1d   :  { %p3558_p10 = scmp.ne.s32.totalorder %s97_s18, %s3557_s1  ;;  %p3563_p12 = scmp.lt.s32.totalorder %s3557_s1, %s3557_s1 }
  0x1f   :  { %p3564_p13 = por %p3563_p12, %p3562_p11 }
  0x21   :  { %p3565_p0 = pnand %p3564_p13, %p3558_p10 }
  0x23   :  { %3568 = shalt.err (!%p3565_p0)
}
  0x24   :  { %102 = dma.hbm_to_vmem [thread:$0]  %s3888_s9, 2048, %s97_s18, [#allocation12], %s3680_s28, %s3680_s28, %s3681_s29  }
  0x25   :  { %s3686_s26 = smov [#allocation2]  }
  0x26   :  { %s28_s27 = sshll.u32 %s3686_s26, 4  ;;  %s29_s27 = int_to_ptr.vmem [resolvable:$true] %s28_s27 }
  0x27   :  { %s3577_s30 = scalar_lea.vmem %s29_s27, 896  ;;  %p3582_p2 = scmp.lt.s32.totalorder %s29_s27, %s29_s27 }
  0x28   :  { %p3578_p1 = scmp.ne.s32.totalorder %s29_s27, %s3577_s30  ;;  %p3583_p3 = scmp.lt.s32.totalorder %s3577_s30, %s3577_s30 }
  0x2a   :  { %p3584_p4 = por %p3583_p3, %p3582_p2 }
  0x2c   :  { %p3585_p5 = pnand %p3584_p4, %p3578_p1 }
  0x2e   :  { %3588 = shalt.err (!%p3585_p5)
}
  0x2f   :  { %s3687_s5 = smov 448   ;;  %s3688_s14 = smov 28  }
  0x30   :  { %34 = dma.hbm_to_vmem [thread:$0]  %s3879_s0, 896, %s29_s27, [#allocation3], %s3687_s5, %s3687_s5, %s3688_s14  }
  0x31   :  { %s3689_s9 = smov [#allocation7]   ;;  %s3690_s29 = smov [#allocation10]  }
  0x32   :  { %s54_s28 = sshll.u32 %s3689_s9, 4  ;;  %s82_s17 = sshll.u32 %s3690_s29, 4  ;;  %s55_s28 = int_to_ptr.vmem [resolvable:$true] %s54_s28  ;;  %s83_s17 = int_to_ptr.vmem [resolvable:$true] %s82_s17 }
  0x33   :  { %s3597_s18 = scalar_lea.vmem %s55_s28, 2048  ;;  %p3602_p7 = scmp.lt.s32.totalorder %s55_s28, %s55_s28 }
  0x34   :  { %p3598_p6 = scmp.ne.s32.totalorder %s55_s28, %s3597_s18  ;;  %p3603_p8 = scmp.lt.s32.totalorder %s3597_s18, %s3597_s18 }
  0x36   :  { %p3604_p9 = por %p3603_p8, %p3602_p7 }
  0x38   :  { %p3605_p10 = pnand %p3604_p9, %p3598_p6 }
  0x3a   :  { %3608 = shalt.err (!%p3605_p10)
}
  0x3b   :  { %60 = dma.hbm_to_vmem [thread:$0]  %s3882_s3, 2048, %s55_s28, [#allocation6], %s3684_s20, %s3684_s20, %s3685_s21  }
  0x3c   :  { %s3617_s0 = scalar_lea.vmem %s83_s17, 1024  ;;  %p3622_p12 = scmp.lt.s32.totalorder %s83_s17, %s83_s17 }
  0x3d   :  { %p3618_p11 = scmp.ne.s32.totalorder %s83_s17, %s3617_s0  ;;  %p3623_p13 = scmp.lt.s32.totalorder %s3617_s0, %s3617_s0 }
  0x3f   :  { %p3624_p0 = por %p3623_p13, %p3622_p12 }
  0x41   :  { %p3625_p1 = pnand %p3624_p0, %p3618_p11 }
  0x43   :  { %3628 = shalt.err (!%p3625_p1)
}
  0x44   :  { %88 = dma.hbm_to_vmem [thread:$0]  %s3886_s7, 1024, %s83_s17, [#allocation9], %s3684_s20, %s3684_s20, %s3685_s21  }
  0x45   :  { %s3691_s24 = smov [#allocation13]  }
  0x46   :  { %s110_s25 = sshll.u32 %s3691_s24, 4  ;;  %s111_s25 = int_to_ptr.vmem [resolvable:$true] %s110_s25 }
  0x47   :  { %s3637_s26 = scalar_lea.vmem %s111_s25, 14336  ;;  %p3642_p3 = scmp.lt.s32.totalorder %s111_s25, %s111_s25 }
  0x48   :  { %p3638_p2 = scmp.ne.s32.totalorder %s111_s25, %s3637_s26  ;;  %p3643_p4 = scmp.lt.s32.totalorder %s3637_s26, %s3637_s26 }
  0x4a   :  { %p3644_p5 = por %p3643_p4, %p3642_p3 }
  0x4c   :  { %p3645_p6 = pnand %p3644_p5, %p3638_p2 }
  0x4e   :  { %3648 = shalt.err (!%p3645_p6)
}
  0x4f   :  { %116 = dma.hbm_to_vmem [thread:$0]  %s3890_s11, 14336, %s111_s25, [#allocation12], %s3687_s5, %s3687_s5, %s3688_s14  }
  0x50   :  { %3669 = dma.done.wait [#allocation3], 896  }
  0x51   :  { %3670 = vsyncadd [#allocation3], 4294966400 }
  0x52   :  { %3671 = dma.done.wait [#allocation6], 16384  }
  0x53   :  { %3672 = vsyncadd [#allocation6], 4294950912 }
  0x54   :  { %3673 = dma.done.wait [#allocation9], 2048  }
  0x55   :  { %3674 = vsyncadd [#allocation9], 4294965248 }
  0x56   :  { %3675 = dma.done.wait [#allocation12], 16384  }
  0x57   :  { %3676 = vsyncadd [#allocation12], 4294950912  ;;  %v3059_v0 = vld [vmem:[#allocation5 + $0x74] ss:$8 sps:$4 sm:$0xff]   ;;  %v3061_v1 = vld [vmem:[#allocation5 + $0x70] ss:$8 sps:$4 sm:$0xff]  }
  0x58   :  { %869 = vmatprep.subr.bf16.mxu0 %v3059_v0  ;;  %v3062_v2 = vld [vmem:[#allocation5 + $0x174] ss:$8 sps:$4 sm:$0xff]   ;;  %v3064_v3 = vld [vmem:[#allocation5 + $0x170] ss:$8 sps:$4 sm:$0xff]   ;;  %v3065_v4 = vld [vmem:[#allocation5 + $0x64] ss:$8 sps:$4 sm:$0xff]  }
  0x59   :  { %870 = vmatpush1.bf16.msra.mxu0 %v3061_v1  ;;  %v3067_v5 = vld [vmem:[#allocation5 + $0x60] ss:$8 sps:$4 sm:$0xff]   ;;  %912 = vmatprep.subr.bf16.mxu1 %v3062_v2  ;;  %v3068_v6 = vld [vmem:[#allocation5 + $0x164] ss:$8 sps:$4 sm:$0xff]   ;;  %v3071_v8 = vld [vmem:[#allocation5 + $0x54] ss:$8 sps:$4 sm:$0xff]  }
  0x5a   :  { %913 = vmatpush1.bf16.msra.mxu1 %v3064_v3  ;;  %871 = vmatprep.subr.bf16.mxu0 %v3065_v4  ;;  %v3070_v7 = vld [vmem:[#allocation5 + $0x160] ss:$8 sps:$4 sm:$0xff]   ;;  %v3073_v9 = vld [vmem:[#allocation5 + $0x50] ss:$8 sps:$4 sm:$0xff]   ;;  %v3074_v10 = vld [vmem:[#allocation5 + $0x154] ss:$8 sps:$4 sm:$0xff]  }
  0x5b   :  { %914 = vmatprep.subr.bf16.mxu1 %v3068_v6  ;;  %v3077_v11 = vld [vmem:[#allocation5 + $0x44] ss:$8 sps:$4 sm:$0xff]   ;;  %v3076_v12 = vld [vmem:[#allocation5 + $0x150] ss:$8 sps:$4 sm:$0xff]   ;;  %v3079_v14 = vld [vmem:[#allocation5 + $0x40] ss:$8 sps:$4 sm:$0xff]  }
  0x5c   :  { %v3080_v13 = vld [vmem:[#allocation5 + $0x144] ss:$8 sps:$4 sm:$0xff]   ;;  %v3083_v15 = vld [vmem:[#allocation5 + $0x34] ss:$8 sps:$4 sm:$0xff]   ;;  %v3082_v16 = vld [vmem:[#allocation5 + $0x140] ss:$8 sps:$4 sm:$0xff]  }
  0x5d   :  { %872 = vmatpush1.bf16.msra.mxu0 %v3067_v5  ;;  %v3086_v17 = vld [vmem:[#allocation5 + $0x134] ss:$8 sps:$4 sm:$0xff]   ;;  %v3085_v18 = vld [vmem:[#allocation5 + $0x30] ss:$8 sps:$4 sm:$0xff]   ;;  %v3089_v19 = vld [vmem:[#allocation5 + $0x24] ss:$8 sps:$4 sm:$0xff]  }
  0x5e   :  { %873 = vmatprep.subr.bf16.mxu0 %v3071_v8  ;;  %915 = vmatpush1.bf16.msra.mxu1 %v3070_v7  ;;  %v3088_v20 = vld [vmem:[#allocation5 + $0x130] ss:$8 sps:$4 sm:$0xff]   ;;  %v3092_v21 = vld [vmem:[#allocation5 + $0x124] ss:$8 sps:$4 sm:$0xff]   ;;  %v3091_v22 = vld [vmem:[#allocation5 + $0x20] ss:$8 sps:$4 sm:$0xff]  }
  0x5f   :  { %916 = vmatprep.subr.bf16.mxu1 %v3074_v10  ;;  %v3095_v23 = vld [vmem:[#allocation5 + $0x14] ss:$8 sps:$4 sm:$0xff]   ;;  %v3094_v24 = vld [vmem:[#allocation5 + $0x120] ss:$8 sps:$4 sm:$0xff]   ;;  %v3097_v26 = vld [vmem:[#allocation5 + $0x10] ss:$8 sps:$4 sm:$0xff]  }
  0x60   :  { %v3098_v25 = vld [vmem:[#allocation5 + $0x114] ss:$8 sps:$4 sm:$0xff]   ;;  %v3101_v27 = vld [vmem:[#allocation5 + $0x4] ss:$8 sps:$4 sm:$0xff]   ;;  %v3100_v28 = vld [vmem:[#allocation5 + $0x110] ss:$8 sps:$4 sm:$0xff]  }
  0x61   :  { %874 = vmatpush1.bf16.msra.mxu0 %v3073_v9  ;;  %v3104_v29 = vld [vmem:[#allocation5 + $0x104] ss:$8 sps:$4 sm:$0xff]   ;;  %v3103_v30 = vld [vmem:[#allocation5] ss:$8 sps:$4 sm:$0xff]   ;;  %v3107_v31 = vld [vmem:[#allocation5 + $0xf4] ss:$8 sps:$4 sm:$0xff]  }
  0x62   :  { %875 = vmatprep.subr.bf16.mxu0 %v3077_v11  ;;  %917 = vmatpush1.bf16.msra.mxu1 %v3076_v12  ;;  %v3106_v32 = vld [vmem:[#allocation5 + $0x100] ss:$8 sps:$4 sm:$0xff]   ;;  %v3110_v33 = vld [vmem:[#allocation5 + $0x1f4] ss:$8 sps:$4 sm:$0xff]   ;;  %v3109_v34 = vld [vmem:[#allocation5 + $0xf0] ss:$8 sps:$4 sm:$0xff]  }
  0x63   :  { %918 = vmatprep.subr.bf16.mxu1 %v3080_v13  ;;  %v3113_v35 = vld [vmem:[#allocation5 + $0xe4] ss:$8 sps:$4 sm:$0xff]   ;;  %v3112_v36 = vld [vmem:[#allocation5 + $0x1f0] ss:$8 sps:$4 sm:$0xff]   ;;  %v3115_v38 = vld [vmem:[#allocation5 + $0xe0] ss:$8 sps:$4 sm:$0xff]  }
  0x64   :  { %v3116_v37 = vld [vmem:[#allocation5 + $0x1e4] ss:$8 sps:$4 sm:$0xff]   ;;  %v3119_v39 = vld [vmem:[#allocation5 + $0xd4] ss:$8 sps:$4 sm:$0xff]   ;;  %v3118_v40 = vld [vmem:[#allocation5 + $0x1e0] ss:$8 sps:$4 sm:$0xff]  }
  0x65   :  { %876 = vmatpush1.bf16.msra.mxu0 %v3079_v14  ;;  %v3122_v41 = vld [vmem:[#allocation5 + $0x1d4] ss:$8 sps:$4 sm:$0xff]   ;;  %v3121_v42 = vld [vmem:[#allocation5 + $0xd0] ss:$8 sps:$4 sm:$0xff]   ;;  %v3125_v43 = vld [vmem:[#allocation5 + $0xc4] ss:$8 sps:$4 sm:$0xff]  }
  0x66   :  { %877 = vmatprep.subr.bf16.mxu0 %v3083_v15  ;;  %919 = vmatpush1.bf16.msra.mxu1 %v3082_v16  ;;  %v3124_v44 = vld [vmem:[#allocation5 + $0x1d0] ss:$8 sps:$4 sm:$0xff]   ;;  %v3128_v45 = vld [vmem:[#allocation5 + $0x1c4] ss:$8 sps:$4 sm:$0xff]   ;;  %v3127_v46 = vld [vmem:[#allocation5 + $0xc0] ss:$8 sps:$4 sm:$0xff]  }
  0x67   :  { %920 = vmatprep.subr.bf16.mxu1 %v3086_v17  ;;  %v3156_v47 = vld [vmem:[#allocation2 + $0x4] ss:$28 sps:$4 sm:$0xff]   ;;  %v3131_v48 = vld [vmem:[#allocation5 + $0xb4] ss:$8 sps:$4 sm:$0xff]   ;;  %v3133_v52 = vld [vmem:[#allocation5 + $0xb0] ss:$8 sps:$4 sm:$0xff]  }
  0x68   :  { %v3130_v49 = vld [vmem:[#allocation5 + $0x1c0] ss:$8 sps:$4 sm:$0xff]   ;;  %901 = vmatprep.mubr.bf16.mxu0 %v3156_v47  ;;  %v3134_v50 = vld [vmem:[#allocation5 + $0x1b4] ss:$8 sps:$4 sm:$0xff]   ;;  %v3137_v53 = vld [vmem:[#allocation5 + $0xa4] ss:$8 sps:$4 sm:$0xff]  }
  0x69   :  { %878 = vmatpush1.bf16.msra.mxu0 %v3085_v18  ;;  %v3163_v51 = vld [vmem:[#allocation2 + $0xc] ss:$28 sps:$4 sm:$0xff]   ;;  %v3140_v55 = vld [vmem:[#allocation5 + $0x1a4] ss:$8 sps:$4 sm:$0xff]   ;;  %v3139_v56 = vld [vmem:[#allocation5 + $0xa0] ss:$8 sps:$4 sm:$0xff]  }
  0x6a   :  { %879 = vmatprep.subr.bf16.mxu0 %v3089_v19  ;;  %921 = vmatpush1.bf16.msra.mxu1 %v3088_v20  ;;  %v3136_v54 = vld [vmem:[#allocation5 + $0x1b0] ss:$8 sps:$4 sm:$0xff]   ;;  %v3143_v57 = vld [vmem:[#allocation5 + $0x94] ss:$8 sps:$4 sm:$0xff]   ;;  %v3142_v58 = vld [vmem:[#allocation5 + $0x1a0] ss:$8 sps:$4 sm:$0xff]  }
  0x6b   :  { %922 = vmatprep.subr.bf16.mxu1 %v3092_v21  ;;  %944 = vmatprep.mubr.bf16.mxu1 %v3163_v51  ;;  %v3146_v59 = vld [vmem:[#allocation5 + $0x194] ss:$8 sps:$4 sm:$0xff]   ;;  %v3145_v60 = vld [vmem:[#allocation5 + $0x90] ss:$8 sps:$4 sm:$0xff]   ;;  %v3149_v61 = vld [vmem:[#allocation5 + $0x84] ss:$8 sps:$4 sm:$0xff]  }
  0x6c   :  { %v3148_v62 = vld [vmem:[#allocation5 + $0x190] ss:$8 sps:$4 sm:$0xff]   ;;  %v3152_v63 = vld [vmem:[#allocation5 + $0x184] ss:$8 sps:$4 sm:$0xff]   ;;  %v3151_v0 = vld [vmem:[#allocation5 + $0x80] ss:$8 sps:$4 sm:$0xff]  }
  0x6d   :  { %880 = vmatpush1.bf16.msra.mxu0 %v3091_v22  ;;  %v3160_v1 = vld [vmem:[#allocation5 + $0x274] ss:$8 sps:$4 sm:$0xff]   ;;  %v3157_v2 = vld [vmem:[#allocation5 + $0x180] ss:$8 sps:$4 sm:$0xff]   ;;  %v3158_v5 = vld [vmem:[#allocation5 + $0x270] ss:$8 sps:$4 sm:$0xff]  }
  0x6e   :  { %881 = vmatprep.subr.bf16.mxu0 %v3095_v23  ;;  %923 = vmatpush1.bf16.msra.mxu1 %v3094_v24  ;;  %v3154_v3 = vld [vmem:[#allocation2] ss:$28 sps:$4 sm:$0xff]   ;;  %v3187_v4 = vld [vmem:[#allocation5 + $0x374] ss:$8 sps:$4 sm:$0xff]   ;;  %v3161_v6 = vld [vmem:[#allocation2 + $0x8] ss:$28 sps:$4 sm:$0xff]  }
  0x6f   :  { %924 = vmatprep.subr.bf16.mxu1 %v3098_v25  ;;  %v3166_v7 = vld [vmem:[#allocation5 + $0x264] ss:$8 sps:$4 sm:$0xff]   ;;  %v3185_v8 = vld [vmem:[#allocation5 + $0x370] ss:$8 sps:$4 sm:$0xff]   ;;  %v3164_v10 = vld [vmem:[#allocation5 + $0x260] ss:$8 sps:$4 sm:$0xff]  }
  0x70   :  { %v3193_v9 = vld [vmem:[#allocation5 + $0x364] ss:$8 sps:$4 sm:$0xff]   ;;  %v3169_v11 = vld [vmem:[#allocation5 + $0x254] ss:$8 sps:$4 sm:$0xff]   ;;  %v3191_v12 = vld [vmem:[#allocation5 + $0x360] ss:$8 sps:$4 sm:$0xff]  }
  0x71   :  { %882 = vmatpush1.bf16.msra.mxu0 %v3097_v26  ;;  %v3692_v13 = vmov 0   ;;  %v3199_v14 = vld [vmem:[#allocation5 + $0x354] ss:$8 sps:$4 sm:$0xff]   ;;  %v3167_v15 = vld [vmem:[#allocation5 + $0x250] ss:$8 sps:$4 sm:$0xff]   ;;  %vm3694_vm0 = vmmov 0  }
  0x72   :  { %883 = vmatprep.subr.bf16.mxu0 %v3101_v27  ;;  %925 = vmatpush1.bf16.msra.mxu1 %v3100_v28  ;;  %v3172_v16 = vld [vmem:[#allocation5 + $0x244] ss:$8 sps:$4 sm:$0xff]   ;;  %v3197_v17 = vld [vmem:[#allocation5 + $0x350] ss:$8 sps:$4 sm:$0xff]   ;;  %v3170_v19 = vld [vmem:[#allocation5 + $0x240] ss:$8 sps:$4 sm:$0xff]  }
  0x73   :  { %926 = vmatprep.subr.bf16.mxu1 %v3104_v29  ;;  %v3205_v18 = vld [vmem:[#allocation5 + $0x344] ss:$8 sps:$4 sm:$0xff]   ;;  %v3175_v20 = vld [vmem:[#allocation5 + $0x234] ss:$8 sps:$4 sm:$0xff]   ;;  %v3173_v21 = vld [vmem:[#allocation5 + $0x230] ss:$8 sps:$4 sm:$0xff]  }
  0x74   :  { %v3203_v22 = vld [vmem:[#allocation5 + $0x340] ss:$8 sps:$4 sm:$0xff]   ;;  %v3211_v23 = vld [vmem:[#allocation5 + $0x334] ss:$8 sps:$4 sm:$0xff]   ;;  %v3178_v24 = vld [vmem:[#allocation5 + $0x224] ss:$8 sps:$4 sm:$0xff]  }
  0x75   :  { %884 = vmatpush1.bf16.msra.mxu0 %v3103_v30  ;;  %v3209_v25 = vld [vmem:[#allocation5 + $0x330] ss:$8 sps:$4 sm:$0xff]   ;;  %v3217_v27 = vld [vmem:[#allocation5 + $0x324] ss:$8 sps:$4 sm:$0xff]   ;;  %v3176_v28 = vld [vmem:[#allocation5 + $0x220] ss:$8 sps:$4 sm:$0xff]  }
  0x76   :  { %885 = vmatprep.subr.bf16.mxu0 %v3107_v31  ;;  %927 = vmatpush1.bf16.msra.mxu1 %v3106_v32  ;;  %v3236_v26 = vld [vmem:[#allocation2 + $0x14] ss:$28 sps:$4 sm:$0xff]   ;;  %v3215_v30 = vld [vmem:[#allocation5 + $0x320] ss:$8 sps:$4 sm:$0xff]  }
  0x77   :  { %928 = vmatprep.subr.bf16.mxu1 %v3110_v33  ;;  %v3181_v29 = vld [vmem:[#allocation5 + $0x214] ss:$8 sps:$4 sm:$0xff]   ;;  %v3179_v32 = vld [vmem:[#allocation5 + $0x210] ss:$8 sps:$4 sm:$0xff]   ;;  %v3184_v33 = vld [vmem:[#allocation5 + $0x204] ss:$8 sps:$4 sm:$0xff]  }
  0x78   :  { %v3223_v31 = vld [vmem:[#allocation5 + $0x314] ss:$8 sps:$4 sm:$0xff]  }
  0x79   :  { %886 = vmatpush2.bf16.msra.mxu0 %v3109_v34  ;;  %v3221_v34 = vld [vmem:[#allocation5 + $0x310] ss:$8 sps:$4 sm:$0xff]   ;;  %v3214_v47 = vld [vmem:[#allocation5 + $0x2b4] ss:$8 sps:$4 sm:$0xff]  }
  0x7a   :  { %887 = vmatprep.subr.bf16.mxu0 %v3113_v35  ;;  %929 = vmatpush2.bf16.msra.mxu1 %v3112_v36  ;;  %v3229_v35 = vld [vmem:[#allocation5 + $0x304] ss:$8 sps:$4 sm:$0xff]   ;;  %v3182_v36 = vld [vmem:[#allocation5 + $0x200] ss:$8 sps:$4 sm:$0xff]   ;;  %v3226_v51 = vld [vmem:[#allocation5 + $0x294] ss:$8 sps:$4 sm:$0xff]  }
  0x7b   :  { %930 = vmatprep.subr.bf16.mxu1 %v3116_v37  ;;  %v3190_v37 = vld [vmem:[#allocation5 + $0x2f4] ss:$8 sps:$4 sm:$0xff]  }
  0x7d   :  { %888 = vmatpush2.bf16.msra.mxu0 %v3115_v38  ;;  %v3227_v38 = vld [vmem:[#allocation5 + $0x300] ss:$8 sps:$4 sm:$0xff]  }
  0x7e   :  { %889 = vmatprep.subr.bf16.mxu0 %v3119_v39  ;;  %931 = vmatpush2.bf16.msra.mxu1 %v3118_v40  ;;  %v3188_v39 = vld [vmem:[#allocation5 + $0x2f0] ss:$8 sps:$4 sm:$0xff]   ;;  %v3196_v40 = vld [vmem:[#allocation5 + $0x2e4] ss:$8 sps:$4 sm:$0xff]  }
  0x7f   :  { %932 = vmatprep.subr.bf16.mxu1 %v3122_v41  ;;  %v3233_v41 = vld [vmem:[#allocation2 + $0x18] ss:$28 sps:$4 sm:$0xff]  }
  0x81   :  { %890 = vmatpush2.bf16.msra.mxu0 %v3121_v42  ;;  %v3194_v42 = vld [vmem:[#allocation5 + $0x2e0] ss:$8 sps:$4 sm:$0xff]  }
  0x82   :  { %891 = vmatprep.subr.bf16.mxu0 %v3125_v43  ;;  %933 = vmatpush2.bf16.msra.mxu1 %v3124_v44  ;;  %v3202_v43 = vld [vmem:[#allocation5 + $0x2d4] ss:$8 sps:$4 sm:$0xff]   ;;  %v3200_v44 = vld [vmem:[#allocation5 + $0x2d0] ss:$8 sps:$4 sm:$0xff]  }
  0x83   :  { %934 = vmatprep.subr.bf16.mxu1 %v3128_v45  ;;  %v3208_v45 = vld [vmem:[#allocation5 + $0x2c4] ss:$8 sps:$4 sm:$0xff]  }
  0x85   :  { %892 = vmatpush2.bf16.msra.mxu0 %v3127_v46  ;;  %v3206_v46 = vld [vmem:[#allocation5 + $0x2c0] ss:$8 sps:$4 sm:$0xff]  }
  0x86   :  { %893 = vmatprep.subr.bf16.mxu0 %v3131_v48  ;;  %935 = vmatpush2.bf16.msra.mxu1 %v3130_v49  ;;  %v3212_v48 = vld [vmem:[#allocation5 + $0x2b0] ss:$8 sps:$4 sm:$0xff]   ;;  %v3220_v49 = vld [vmem:[#allocation5 + $0x2a4] ss:$8 sps:$4 sm:$0xff]  }
  0x87   :  { %936 = vmatprep.subr.bf16.mxu1 %v3134_v50  ;;  %v3218_v50 = vld [vmem:[#allocation5 + $0x2a0] ss:$8 sps:$4 sm:$0xff]  }
  0x89   :  { %894 = vmatpush2.bf16.msra.mxu0 %v3133_v52  ;;  %v3224_v52 = vld [vmem:[#allocation5 + $0x290] ss:$8 sps:$4 sm:$0xff]  }
  0x8a   :  { %895 = vmatprep.subr.bf16.mxu0 %v3137_v53  ;;  %937 = vmatpush2.bf16.msra.mxu1 %v3136_v54  ;;  %v3232_v53 = vld [vmem:[#allocation5 + $0x284] ss:$8 sps:$4 sm:$0xff]   ;;  %v3230_v54 = vld [vmem:[#allocation5 + $0x280] ss:$8 sps:$4 sm:$0xff]  }
  0x8b   :  { %938 = vmatprep.subr.bf16.mxu1 %v3140_v55  ;;  %v3234_v55 = vld [vmem:[#allocation2 + $0x10] ss:$28 sps:$4 sm:$0xff]  }
  0x8d   :  { %896 = vmatpush2.bf16.msra.mxu0 %v3139_v56  ;;  %v3237_v56 = vld [vmem:[#allocation7 + $0x78] sm:$0xff]  }
  0x8e   :  { %897 = vmatprep.subr.bf16.mxu0 %v3143_v57  ;;  %939 = vmatpush2.bf16.msra.mxu1 %v3142_v58  ;;  %v3238_v57 = vld [vmem:[#allocation7 + $0x38] sm:$0xff]   ;;  %v3239_v58 = vld [vmem:[#allocation7 + $0x70] sm:$0xff]  }
  0x8f   :  { %940 = vmatprep.subr.bf16.mxu1 %v3146_v59  ;;  %v3240_v59 = vld [vmem:[#allocation7 + $0x30] sm:$0xff]  }
  0x91   :  { %898 = vmatpush2.bf16.msra.mxu0 %v3145_v60  ;;  %v3241_v60 = vld [vmem:[#allocation7 + $0x68] sm:$0xff]  }
  0x92   :  { %899 = vmatprep.subr.bf16.mxu0 %v3149_v61  ;;  %941 = vmatpush2.bf16.msra.mxu1 %v3148_v62  ;;  %v3242_v61 = vld [vmem:[#allocation7 + $0x28] sm:$0xff]   ;;  %v3243_v62 = vld [vmem:[#allocation7 + $0x60] sm:$0xff]  }
  0x93   :  { %942 = vmatprep.subr.bf16.mxu1 %v3152_v63  ;;  %v3244_v63 = vld [vmem:[#allocation7 + $0x20] sm:$0xff]  }
  0x95   :  { %900 = vmatpush2.bf16.msra.mxu0 %v3151_v0  ;;  %v3245_v0 = vld [vmem:[#allocation7 + $0x58] sm:$0xff]  }
  0x96   :  { %955 = vmatprep.subr.bf16.mxu0 %v3160_v1  ;;  %943 = vmatpush2.bf16.msra.mxu1 %v3157_v2  ;;  %v3246_v1 = vld [vmem:[#allocation7 + $0x18] sm:$0xff]   ;;  %v3247_v2 = vld [vmem:[#allocation7 + $0x50] sm:$0xff]  }
  0x97   :  { %998 = vmatprep.subr.bf16.mxu1 %v3187_v4  ;;  %v3249_v4 = vld [vmem:[#allocation7 + $0x48] sm:$0xff]  }
  0x98   :  { %902 = vmatmul.mubr.bf16.vlgmr.msra.gmra.mxu0 %v3154_v3  ;;  %v3248_v3 = vld [vmem:[#allocation7 + $0x10] sm:$0xff]  }
  0x99   :  { %956 = vmatpush1.bf16.msra.mxu0 %v3158_v5  ;;  %945 = vmatmul.mubr.bf16.vlgmr.msra.gmra.mxu1 %v3161_v6  ;;  %v3250_v5 = vld [vmem:[#allocation7 + $0x8] sm:$0xff]   ;;  %v3251_v6 = vld [vmem:[#allocation7 + $0x40] sm:$0xff]  }
  0x9a   :  { %957 = vmatprep.subr.bf16.mxu0 %v3166_v7  ;;  %999 = vmatpush1.bf16.msra.mxu1 %v3185_v8  ;;  %v3252_v7 = vld [vmem:[#allocation7] sm:$0xff]   ;;  %v3253_v8 = vld [vmem:[#allocation8 + $0x38] sm:$0xff]  }
  0x9b   :  { %1030 = vmatprep.mubr.bf16.mxu1 %v3692_v13  ;;  %1000 = vmatprep.subr.bf16.mxu1 %v3193_v9  ;;  %v3693_v9 = vmov 0.0  }
  0x9c   :  { %987 = vmatprep.mubr.bf16.mxu0 %v3236_v26 }
  0x9d   :  { %958 = vmatpush1.bf16.msra.mxu0 %v3164_v10  ;;  %v3254_v10 = vld [vmem:[#allocation8 + $0x30] sm:$0xff]  }
  0x9e   :  { %959 = vmatprep.subr.bf16.mxu0 %v3169_v11  ;;  %1001 = vmatpush1.bf16.msra.mxu1 %v3191_v12  ;;  %v3255_v11 = vld [vmem:[#allocation8 + $0x28] sm:$0xff]   ;;  %v3256_v12 = vld [vmem:[#allocation8 + $0x20] sm:$0xff]  }
  0x9f   :  { %1002 = vmatprep.subr.bf16.mxu1 %v3199_v14  ;;  %v263_v14 = vlaneseq }
  0xa1   :  { %960 = vmatpush1.bf16.msra.mxu0 %v3167_v15 }
  0xa2   :  { %961 = vmatprep.subr.bf16.mxu0 %v3172_v16  ;;  %1003 = vmatpush1.bf16.msra.mxu1 %v3197_v17  ;;  %v3811_v16 = vshrl.u32 %v263_v14, 7 }
  0xa3   :  { %1004 = vmatprep.subr.bf16.mxu1 %v3205_v18 }
  0xa5   :  { %962 = vmatpush1.bf16.msra.mxu0 %v3170_v19  ;;  %v3814_v19 = vsub.s32 1, %v3811_v16 }
  0xa6   :  { %963 = vmatprep.subr.bf16.mxu0 %v3175_v20  ;;  %1005 = vmatpush1.bf16.msra.mxu1 %v3203_v22  ;;  %v261_v20 = vld [vmem:[%s3881_s2] sm:$0x3] }
  0xa7   :  { %1006 = vmatprep.subr.bf16.mxu1 %v3211_v23 }
  0xa9   :  { %964 = vmatpush1.bf16.msra.mxu0 %v3173_v21  ;;  %v3820_v21 = vsub.s32 0, %v3811_v16 }
  0xaa   :  { %965 = vmatprep.subr.bf16.mxu0 %v3178_v24  ;;  %1007 = vmatpush1.bf16.msra.mxu1 %v3209_v25  ;;  %v270_v24 = vrot.slane %v261_v20, %v3814_v19 }
  0xab   :  { %1008 = vmatprep.subr.bf16.mxu1 %v3217_v27  ;;  %v266_v25 = vrot.slane %v261_v20, %v3820_v21  ;;  %v3266_v20 = vld [vmem:[#allocation10 + $0x10] sm:$0xff]  }
  0xad   :  { %966 = vmatpush1.bf16.msra.mxu0 %v3176_v28 }
  0xae   :  { %967 = vmatprep.subr.bf16.mxu0 %v3181_v29  ;;  %1009 = vmatpush1.bf16.msra.mxu1 %v3215_v30 }
  0xaf   :  { %1010 = vmatprep.subr.bf16.mxu1 %v3223_v31 }
  0xb1   :  { %968 = vmatpush1.bf16.msra.mxu0 %v3179_v32 }
  0xb2   :  { %969 = vmatprep.subr.bf16.mxu0 %v3184_v33  ;;  %1011 = vmatpush1.bf16.msra.mxu1 %v3221_v34 }
  0xb3   :  { %1012 = vmatprep.subr.bf16.mxu1 %v3229_v35 }
  0xb5   :  { %970 = vmatpush1.bf16.msra.mxu0 %v3182_v36 }
  0xb6   :  { %971 = vmatprep.subr.bf16.mxu0 %v3190_v37  ;;  %1013 = vmatpush1.bf16.msra.mxu1 %v3227_v38 }
  0xb7   :  { %2938 = vmatprep.subr.bf16.mxu1 %v3237_v56 }
  0xb9   :  { %972 = vmatpush2.bf16.msra.mxu0 %v3188_v39  ;;  %1031 = vmatmul.mubr.bf16.vlgmr.msra.gmra.mxu1 %v3233_v41 }
  0xba   :  { %973 = vmatprep.subr.bf16.mxu0 %v3196_v40  ;;  %2939 = vmatpush3.bf16.msra.mxu1 %v3238_v57 }
  0xbb   :  { %2940 = vmatprep.subr.bf16.mxu1 %v3239_v58 }
  0xbd   :  { %974 = vmatpush2.bf16.msra.mxu0 %v3194_v42 }
  0xbe   :  { %975 = vmatprep.subr.bf16.mxu0 %v3202_v43  ;;  %2941 = vmatpush3.bf16.msra.mxu1 %v3240_v59  ;;  %v3257_v59 = vld [vmem:[#allocation8 + $0x18] sm:$0xff]  }
  0xbf   :  { %2942 = vmatprep.subr.bf16.mxu1 %v3241_v60  ;;  %v3258_v60 = vld [vmem:[#allocation8 + $0x10] sm:$0xff]  }
  0xc1   :  { %976 = vmatpush2.bf16.msra.mxu0 %v3200_v44 }
  0xc2   :  { %977 = vmatprep.subr.bf16.mxu0 %v3208_v45  ;;  %2943 = vmatpush3.bf16.msra.mxu1 %v3242_v61  ;;  %v3259_v61 = vld [vmem:[#allocation8 + $0x8] sm:$0xff]  }
  0xc3   :  { %2944 = vmatprep.subr.bf16.mxu1 %v3243_v62  ;;  %v3260_v62 = vld [vmem:[#allocation8] sm:$0xff]  }
  0xc5   :  { %978 = vmatpush2.bf16.msra.mxu0 %v3206_v46 }
  0xc6   :  { %979 = vmatprep.subr.bf16.mxu0 %v3214_v47  ;;  %2945 = vmatpush3.bf16.msra.mxu1 %v3244_v63  ;;  %v3261_v63 = vld [vmem:[#allocation10 + $0x38] sm:$0xff]  }
  0xc7   :  { %2946 = vmatprep.subr.bf16.mxu1 %v3245_v0  ;;  %v3262_v0 = vld [vmem:[#allocation10 + $0x30] sm:$0xff]  }
  0xc9   :  { %980 = vmatpush2.bf16.msra.mxu0 %v3212_v48 }
  0xca   :  { %981 = vmatprep.subr.bf16.mxu0 %v3220_v49  ;;  %2947 = vmatpush3.bf16.msra.mxu1 %v3246_v1  ;;  %v3263_v1 = vld [vmem:[#allocation10 + $0x28] sm:$0xff]  }
  0xcb   :  { %2948 = vmatprep.subr.bf16.mxu1 %v3247_v2  ;;  %v3264_v2 = vld [vmem:[#allocation10 + $0x20] sm:$0xff]  }
  0xcd   :  { %982 = vmatpush2.bf16.msra.mxu0 %v3218_v50 }
  0xce   :  { %983 = vmatprep.subr.bf16.mxu0 %v3226_v51  ;;  %2949 = vmatpush3.bf16.msra.mxu1 %v3248_v3  ;;  %v3265_v3 = vld [vmem:[#allocation10 + $0x18] sm:$0xff]  }
  0xcf   :  { %2950 = vmatprep.subr.bf16.mxu1 %v3249_v4 }
  0xd1   :  { %984 = vmatpush2.bf16.msra.mxu0 %v3224_v52 }
  0xd2   :  { %985 = vmatprep.subr.bf16.mxu0 %v3232_v53  ;;  %2951 = vmatpush3.bf16.msra.mxu1 %v3250_v5 }
  0xd3   :  { %2952 = vmatprep.subr.bf16.mxu1 %v3251_v6 }
  0xd5   :  { %986 = vmatpush2.bf16.msra.mxu0 %v3230_v54 }
  0xd6   :  { %2953 = vmatpush3.bf16.msra.mxu1 %v3252_v7  ;;  %3000 = vmatprep.subr.bf16.mxu0 %v3693_v9  ;;  %v2761_v7 = vld [vmem:[%s3883_s4] ss:$0 sm:$0xff] }
  0xd7   :  { %3020 = vmatprep.subr.bf16.mxu1 %v3693_v9 }
  0xd8   :  { %988 = vmatmul.mubr.bf16.vlgmr.msra.gmra.mxu0 %v3234_v55 }
  0xd9   :  { %3001 = vmatpush3.bf16.msra.mxu0 %v3253_v8  ;;  %3016 = vmatprep.mubr.msk.bf16.mxu0 %vm3694_vm0, %v3693_v9 }
  0xda   :  { %3002 = vmatprep.subr.bf16.mxu0 %v3693_v9 }
  0xdd   :  { %3003 = vmatpush3.bf16.msra.mxu0 %v3254_v10 }
  0xde   :  { %3004 = vmatprep.subr.bf16.mxu0 %v3693_v9 }
  0xe1   :  { %3005 = vmatpush3.bf16.msra.mxu0 %v3255_v11 }
  0xe2   :  { %3006 = vmatprep.subr.bf16.mxu0 %v3693_v9 }
  0xe5   :  { %3007 = vmatpush3.bf16.msra.mxu0 %v3256_v12 }
  0xe6   :  { %3008 = vmatprep.subr.bf16.mxu0 %v3693_v9 }
  0xe9   :  { %3009 = vmatpush3.bf16.msra.mxu0 %v3257_v59  ;;  %v3325_v59 = vld [vmem:[#allocation13 + $0x74] ss:$28 sps:$4 sm:$0xff]  }
  0xea   :  { %3010 = vmatprep.subr.bf16.mxu0 %v3693_v9 }
  0xed   :  { %3011 = vmatpush3.bf16.msra.mxu0 %v3258_v60  ;;  %v3323_v60 = vld [vmem:[#allocation13 + $0x70] ss:$28 sps:$4 sm:$0xff]  }
  0xee   :  { %3012 = vmatprep.subr.bf16.mxu0 %v3693_v9 }
  0xf1   :  { %3013 = vmatpush3.bf16.msra.mxu0 %v3259_v61  ;;  %v3331_v61 = vld [vmem:[#allocation13 + $0x3c] ss:$28 sps:$4 sm:$0xff]  }
  0xf2   :  { %3014 = vmatprep.subr.bf16.mxu0 %v3693_v9 }
  0xf5   :  { %3015 = vmatpush3.bf16.msra.mxu0 %v3260_v62  ;;  %v3329_v62 = vld [vmem:[#allocation13 + $0x38] ss:$28 sps:$4 sm:$0xff]  }
 0x158   :  { %v903_v17 = vpop.f32.mrf.mxu0 }
 0x159   :  { %v946_v15 = vpop.f32.mrf.mxu1  ;;  %v904_v30 = vadd.f32 %v903_v17, %v266_v25 }
 0x15a   :  { %v905_v22 = vpop.f32.mrf.mxu0 }
 0x15b   :  { %v948_v18 = vpop.f32.mrf.mxu1  ;;  %v906_v29 = vadd.f32 %v905_v22, %v270_v24  ;;  %v947_v37 = vadd.f32 %v946_v15, %v904_v30  ;;  %v3267_v22 = vld [vmem:[#allocation10 + $0x8] sm:$0xff]  }
 0x15c   :  { %v907_v26 = vpop.f32.mrf.mxu0  ;;  %v3278_v30 = vld [vmem:[#allocation11 + $0x40] ss:$8 sps:$4 sm:$0xff]  }
 0x15d   :  { %v950_v23 = vpop.f32.mrf.mxu1  ;;  %v908_v32 = vadd.f32 %v907_v26, %v266_v25  ;;  %v949_v35 = vadd.f32 %v948_v18, %v906_v29  ;;  %v3271_v25 = vld [vmem:[#allocation11 + $0x74] ss:$8 sps:$4 sm:$0xff]   ;;  %v3274_v26 = vld [vmem:[#allocation11 + $0x64] ss:$8 sps:$4 sm:$0xff]  }
 0x15e   :  { %v909_v31 = vpop.f32.mrf.mxu0  ;;  %1564 = vmatprep.subr.bf16.mxu0 %v3271_v25  ;;  %v3280_v29 = vld [vmem:[#allocation11 + $0x44] ss:$8 sps:$4 sm:$0xff]  }
 0x15f   :  { %v952_v27 = vpop.f32.mrf.mxu1  ;;  %v910_v36 = vadd.f32 %v909_v31, %v270_v24  ;;  %v951_v39 = vadd.f32 %v950_v23, %v908_v32  ;;  %v3268_v23 = vld [vmem:[#allocation10] sm:$0xff]   ;;  %v3269_v24 = vld [vmem:[#allocation11 + $0x70] ss:$8 sps:$4 sm:$0xff]   ;;  %v3283_v31 = vld [vmem:[#allocation11 + $0x34] ss:$8 sps:$4 sm:$0xff]  }
 0x160   :  { %v3286_v32 = vld [vmem:[#allocation11 + $0x24] ss:$8 sps:$4 sm:$0xff]  }
 0x161   :  { %v953_v44 = vadd.f32 %v952_v27, %v910_v36  ;;  %v3272_v27 = vld [vmem:[#allocation11 + $0x60] ss:$8 sps:$4 sm:$0xff]   ;;  %v3296_v25 = vld [vmem:[#allocation13 + $0x190] ss:$28 sps:$4 sm:$0xff]  }
 0x179   :  { %v1032_v28 = vpop.f32.mrf.mxu1 }
 0x17b   :  { %v1034_v33 = vpop.f32.mrf.mxu1 }
 0x17d   :  { %v1036_v42 = vpop.f32.mrf.mxu1 }
 0x17f   :  { %v1038_v51 = vpop.f32.mrf.mxu1 }
 0x198   :  { %v989_v34 = vpop.f32.mrf.mxu0 }
 0x199   :  { %v990_v41 = vadd.f32 %v989_v34, %v947_v37  ;;  %v2778_v34 = vld [vmem:[%s3885_s6] ss:$0 sm:$0xff] }
 0x19a   :  { %v991_v38 = vpop.f32.mrf.mxu0 }
 0x19b   :  { %v992_v40 = vadd.f32 %v991_v38, %v949_v35  ;;  %v1033_v50 = vadd.f32 %v1032_v28, %v990_v41  ;;  %v3277_v28 = vld [vmem:[#allocation11 + $0x54] ss:$8 sps:$4 sm:$0xff]  }
 0x19c   :  { %v993_v43 = vpop.f32.mrf.mxu0 }
 0x19d   :  { %v994_v45 = vadd.f32 %v993_v43, %v951_v39  ;;  %v1035_v47 = vadd.f32 %v1034_v33, %v992_v40  ;;  %v1041_v56 = vmax.f32 %v1033_v50, 0.0  ;;  %v3284_v33 = vld [vmem:[#allocation11 + $0x20] ss:$8 sps:$4 sm:$0xff]   ;;  %v3298_v50 = vld [vmem:[#allocation13 + $0x194] ss:$28 sps:$4 sm:$0xff]  }
 0x19e   :  { %v995_v46 = vpop.f32.mrf.mxu0 }
 0x19f   :  { %v1037_v48 = vadd.f32 %v1036_v42, %v994_v45  ;;  %v996_v49 = vadd.f32 %v995_v46, %v953_v44  ;;  %v1042_v54 = vmax.f32 %v1035_v47, 0.0  ;;  %v3289_v44 = vld [vmem:[#allocation11 + $0x14] ss:$8 sps:$4 sm:$0xff]   ;;  %v3287_v45 = vld [vmem:[#allocation11 + $0x10] ss:$8 sps:$4 sm:$0xff]  }
 0x1a0   :  { %v3292_v46 = vld [vmem:[#allocation11 + $0x4] ss:$8 sps:$4 sm:$0xff]   ;;  %v3290_v47 = vld [vmem:[#allocation11] ss:$8 sps:$4 sm:$0xff]  }
 0x1a1   :  { %v1039_v52 = vadd.f32 %v1038_v51, %v996_v49  ;;  %v1043_v53 = vmax.f32 %v1037_v48, 0.0  ;;  %v3293_v48 = vld [vmem:[#allocation13 + $0x188] ss:$28 sps:$4 sm:$0xff]   ;;  %v3301_v51 = vld [vmem:[#allocation13 + $0x154] ss:$28 sps:$4 sm:$0xff]  }
 0x1a2   :  { %v3295_v49 = vld [vmem:[#allocation13 + $0x18c] ss:$28 sps:$4 sm:$0xff]  }
 0x1a3   :  { %v1044_v55 = vmax.f32 %v1039_v52, 0.0  ;;  %v1045_v58 = vpack.c.bf16 %v1043_v53, %v1041_v56  ;;  %v3299_v52 = vld [vmem:[#allocation13 + $0x150] ss:$28 sps:$4 sm:$0xff]   ;;  %v3307_v53 = vld [vmem:[#allocation13 + $0x11c] ss:$28 sps:$4 sm:$0xff]  }
 0x1a4   :  { %v3311_v56 = vld [vmem:[#allocation13 + $0xe0] ss:$28 sps:$4 sm:$0xff]  }
 0x1a5   :  { %v1046_v57 = vpack.c.bf16 %v1044_v55, %v1042_v54  ;;  %v3305_v54 = vld [vmem:[#allocation13 + $0x118] ss:$28 sps:$4 sm:$0xff]   ;;  %v3313_v55 = vld [vmem:[#allocation13 + $0xe4] ss:$28 sps:$4 sm:$0xff]  }
 0x1a7   :  { %1214 = vmatprep.mubr.bf16.mxu1 %v1046_v57  ;;  %v3319_v57 = vld [vmem:[#allocation13 + $0xac] ss:$28 sps:$4 sm:$0xff]  }
 0x1a8   :  { %1215 = vmatmul.mubr.bf16.vlgmr.msra.gmra.mxu1 %v1045_v58  ;;  %v3317_v58 = vld [vmem:[#allocation13 + $0xa8] ss:$28 sps:$4 sm:$0xff]  }
 0x1a9   :  { %3036 = vmatprep.mubr.msk.bf16.mxu1 %vm3694_vm0, %v3693_v9  ;;  %3021 = vmatpush3.bf16.msra.mxu1 %v3261_v63  ;;  %v3337_v63 = vld [vmem:[#allocation13 + $0x4] ss:$28 sps:$4 sm:$0xff]  }
 0x1aa   :  { %3022 = vmatprep.subr.bf16.mxu1 %v3693_v9 }
 0x1ad   :  { %3023 = vmatpush3.bf16.msra.mxu1 %v3262_v0  ;;  %v3335_v0 = vld [vmem:[#allocation13] ss:$28 sps:$4 sm:$0xff]  }
 0x1ae   :  { %3024 = vmatprep.subr.bf16.mxu1 %v3693_v9 }
 0x1b1   :  { %3025 = vmatpush3.bf16.msra.mxu1 %v3263_v1  ;;  %v3343_v1 = vld [vmem:[#allocation13 + $0x34c] ss:$28 sps:$4 sm:$0xff]  }
 0x1b2   :  { %3026 = vmatprep.subr.bf16.mxu1 %v3693_v9 }
 0x1b5   :  { %3027 = vmatpush3.bf16.msra.mxu1 %v3264_v2  ;;  %v3341_v2 = vld [vmem:[#allocation13 + $0x348] ss:$28 sps:$4 sm:$0xff]  }
 0x1b6   :  { %3028 = vmatprep.subr.bf16.mxu1 %v3693_v9 }
 0x1b9   :  { %3029 = vmatpush3.bf16.msra.mxu1 %v3265_v3  ;;  %v3349_v3 = vld [vmem:[#allocation13 + $0x314] ss:$28 sps:$4 sm:$0xff]  }
 0x1ba   :  { %3030 = vmatprep.subr.bf16.mxu1 %v3693_v9 }
 0x1bd   :  { %3031 = vmatpush3.bf16.msra.mxu1 %v3266_v20 }
 0x1be   :  { %3032 = vmatprep.subr.bf16.mxu1 %v3693_v9 }
 0x1c1   :  { %3033 = vmatpush3.bf16.msra.mxu1 %v3267_v22 }
 0x1c2   :  { %3034 = vmatprep.subr.bf16.mxu1 %v3693_v9  ;;  %v3281_v9 = vld [vmem:[#allocation11 + $0x30] ss:$8 sps:$4 sm:$0xff]  }
 0x1c5   :  { %3035 = vmatpush3.bf16.msra.mxu1 %v3268_v23 }
 0x1c6   :  { %2354 = vmatprep.subr.bf16.mxu1 %v3295_v49  ;;  %v3373_v49 = vld [vmem:[#allocation13 + $0x234] ss:$28 sps:$4 sm:$0xff]  }
 0x268   :  { %v2954_v4 = vpop.f32.mrf.mxu1 }
 0x26a   :  { %v2955_v5 = vpop.f32.mrf.mxu1 }
 0x26b   :  { %v2956_v6 = vadd.f32 %v2955_v5, %v2954_v4  ;;  %v3347_v4 = vld [vmem:[#allocation13 + $0x310] ss:$28 sps:$4 sm:$0xff]   ;;  %v3355_v5 = vld [vmem:[#allocation13 + $0x2dc] ss:$28 sps:$4 sm:$0xff]  }
 0x26c   :  { %v2957_v8 = vpop.f32.mrf.mxu1 }
 0x26d   :  { %v1217_v11 = vadd.f32 %v2956_v6, %v2761_v7  ;;  %v3353_v6 = vld [vmem:[#allocation13 + $0x2d8] ss:$28 sps:$4 sm:$0xff]  }
 0x26e   :  { %v2958_v10 = vpop.f32.mrf.mxu1 }
 0x26f   :  { %v2959_v12 = vadd.f32 %v2958_v10, %v2957_v8  ;;  %v1223_v15 = vmax.f32 %v1217_v11, 0.0  ;;  %v3359_v8 = vld [vmem:[#allocation13 + $0x2a0] ss:$28 sps:$4 sm:$0xff]   ;;  %v3367_v10 = vld [vmem:[#allocation13 + $0x26c] ss:$28 sps:$4 sm:$0xff]  }
 0x270   :  { %v3365_v11 = vld [vmem:[#allocation13 + $0x268] ss:$28 sps:$4 sm:$0xff]  }
 0x271   :  { %v1220_v14 = vadd.f32 %v2959_v12, %v2761_v7  ;;  %v3361_v7 = vld [vmem:[#allocation13 + $0x2a4] ss:$28 sps:$4 sm:$0xff]   ;;  %v2787_v12 = vld [vmem:[%s3887_s8] ss:$0 sm:$0xff] }
 0x273   :  { %v1224_v17 = vmax.f32 %v1220_v14, 0.0 }
 0x275   :  { %v1225_v18 = vpack.c.bf16 %v1224_v17, %v1223_v15 }
 0x277   :  { %3017 = vmatmul.mubr.bf16.vlgmr.msra.gmra.mxu0 %v1225_v18 }
 0x278   :  { %1596 = vmatprep.mubr.bf16.mxu0 %v3692_v13  ;;  %1565 = vmatpush1.bf16.msra.mxu0 %v3269_v24  ;;  %v3275_v13 = vld [vmem:[#allocation11 + $0x50] ss:$8 sps:$4 sm:$0xff]  }
 0x279   :  { %1566 = vmatprep.subr.bf16.mxu0 %v3274_v26 }
 0x27c   :  { %1567 = vmatpush1.bf16.msra.mxu0 %v3272_v27  ;;  %v3304_v27 = vld [vmem:[#allocation13 + $0x15c] ss:$28 sps:$4 sm:$0xff]  }
 0x27d   :  { %1568 = vmatprep.subr.bf16.mxu0 %v3277_v28  ;;  %v3302_v28 = vld [vmem:[#allocation13 + $0x158] ss:$28 sps:$4 sm:$0xff]  }
 0x280   :  { %1569 = vmatpush1.bf16.msra.mxu0 %v3275_v13  ;;  %v3310_v13 = vld [vmem:[#allocation13 + $0x124] ss:$28 sps:$4 sm:$0xff]  }
 0x281   :  { %1570 = vmatprep.subr.bf16.mxu0 %v3280_v29  ;;  %v3308_v29 = vld [vmem:[#allocation13 + $0x120] ss:$28 sps:$4 sm:$0xff]  }
 0x284   :  { %1571 = vmatpush1.bf16.msra.mxu0 %v3278_v30  ;;  %v3316_v30 = vld [vmem:[#allocation13 + $0xec] ss:$28 sps:$4 sm:$0xff]  }
 0x285   :  { %1572 = vmatprep.subr.bf16.mxu0 %v3283_v31  ;;  %v3314_v31 = vld [vmem:[#allocation13 + $0xe8] ss:$28 sps:$4 sm:$0xff]  }
 0x288   :  { %1573 = vmatpush1.bf16.msra.mxu0 %v3281_v9  ;;  %v3322_v9 = vld [vmem:[#allocation13 + $0xb4] ss:$28 sps:$4 sm:$0xff]  }
 0x289   :  { %1574 = vmatprep.subr.bf16.mxu0 %v3286_v32  ;;  %v3320_v32 = vld [vmem:[#allocation13 + $0xb0] ss:$28 sps:$4 sm:$0xff]  }
 0x28c   :  { %1575 = vmatpush1.bf16.msra.mxu0 %v3284_v33  ;;  %v3328_v33 = vld [vmem:[#allocation13 + $0x7c] ss:$28 sps:$4 sm:$0xff]  }
 0x28d   :  { %1576 = vmatprep.subr.bf16.mxu0 %v3289_v44  ;;  %v3356_v44 = vld [vmem:[#allocation13 + $0x2e0] ss:$28 sps:$4 sm:$0xff]  }
 0x290   :  { %1577 = vmatpush1.bf16.msra.mxu0 %v3287_v45  ;;  %v3364_v45 = vld [vmem:[#allocation13 + $0x2ac] ss:$28 sps:$4 sm:$0xff]  }
 0x291   :  { %1578 = vmatprep.subr.bf16.mxu0 %v3292_v46  ;;  %v3362_v46 = vld [vmem:[#allocation13 + $0x2a8] ss:$28 sps:$4 sm:$0xff]  }
 0x294   :  { %1579 = vmatpush1.bf16.msra.mxu0 %v3290_v47  ;;  %v3370_v47 = vld [vmem:[#allocation13 + $0x274] ss:$28 sps:$4 sm:$0xff]  }
 0x295   :  { %2397 = vmatprep.subr.bf16.mxu0 %v3298_v50  ;;  %v3376_v50 = vld [vmem:[#allocation13 + $0x23c] ss:$28 sps:$4 sm:$0xff]  }
 0x337   :  { %v1331_v35 = vpop.f32.mrf.mxu0 }
 0x338   :  { %v1332_v37 = vadd.f32 %v2778_v34, %v1331_v35  ;;  %v3334_v35 = vld [vmem:[#allocation13 + $0x44] ss:$28 sps:$4 sm:$0xff]  }
 0x339   :  { %v3018_v36 = vpop.f32.mrf.mxu0 }
 0x33a   :  { %v1338_v41 = vmax.f32 %v1332_v37, 0.0  ;;  %v3332_v36 = vld [vmem:[#allocation13 + $0x40] ss:$28 sps:$4 sm:$0xff]   ;;  %v3340_v37 = vld [vmem:[#allocation13 + $0xc] ss:$28 sps:$4 sm:$0xff]  }
 0x33b   :  { %v1334_v38 = vpop.f32.mrf.mxu0 }
 0x33c   :  { %v1335_v39 = vadd.f32 %v2778_v34, %v1334_v38  ;;  %v3326_v34 = vld [vmem:[#allocation13 + $0x78] ss:$28 sps:$4 sm:$0xff]   ;;  %v3338_v38 = vld [vmem:[#allocation13 + $0x8] ss:$28 sps:$4 sm:$0xff]  }
 0x33d   :  { %v3019_v40 = vpop.f32.mrf.mxu0 }
 0x33e   :  { %v1339_v42 = vmax.f32 %v1335_v39, 0.0  ;;  %v3346_v39 = vld [vmem:[#allocation13 + $0x354] ss:$28 sps:$4 sm:$0xff]  }
 0x33f   :  { %v3344_v40 = vld [vmem:[#allocation13 + $0x350] ss:$28 sps:$4 sm:$0xff]  }
 0x340   :  { %v1340_v43 = vpack.c.bf16 %v1339_v42, %v1338_v41  ;;  %v3352_v41 = vld [vmem:[#allocation13 + $0x31c] ss:$28 sps:$4 sm:$0xff]  }
 0x341   :  { %v3350_v42 = vld [vmem:[#allocation13 + $0x318] ss:$28 sps:$4 sm:$0xff]  }
 0x342   :  { %3037 = vmatmul.mubr.bf16.vlgmr.msra.gmra.mxu1 %v1340_v43  ;;  %v3358_v43 = vld [vmem:[#allocation13 + $0x2e4] ss:$28 sps:$4 sm:$0xff]  }
 0x343   :  { %2355 = vmatpush1.bf16.msra.mxu1 %v3293_v48  ;;  %v3368_v48 = vld [vmem:[#allocation13 + $0x270] ss:$28 sps:$4 sm:$0xff]  }
 0x344   :  { %2356 = vmatprep.subr.bf16.mxu1 %v3301_v51  ;;  %v3371_v51 = vld [vmem:[#allocation13 + $0x230] ss:$28 sps:$4 sm:$0xff]  }
 0x347   :  { %2357 = vmatpush1.bf16.msra.mxu1 %v3299_v52  ;;  %v3374_v52 = vld [vmem:[#allocation13 + $0x238] ss:$28 sps:$4 sm:$0xff]  }
 0x348   :  { %2358 = vmatprep.subr.bf16.mxu1 %v3307_v53  ;;  %v3379_v53 = vld [vmem:[#allocation13 + $0x1fc] ss:$28 sps:$4 sm:$0xff]  }
 0x34b   :  { %2359 = vmatpush1.bf16.msra.mxu1 %v3305_v54  ;;  %v3382_v54 = vld [vmem:[#allocation13 + $0x204] ss:$28 sps:$4 sm:$0xff]  }
 0x34c   :  { %2360 = vmatprep.subr.bf16.mxu1 %v3313_v55  ;;  %v3377_v55 = vld [vmem:[#allocation13 + $0x1f8] ss:$28 sps:$4 sm:$0xff]  }
 0x34f   :  { %2361 = vmatpush1.bf16.msra.mxu1 %v3311_v56  ;;  %v3380_v56 = vld [vmem:[#allocation13 + $0x200] ss:$28 sps:$4 sm:$0xff]  }
 0x350   :  { %2362 = vmatprep.subr.bf16.mxu1 %v3319_v57  ;;  %v3385_v57 = vld [vmem:[#allocation13 + $0x1c4] ss:$28 sps:$4 sm:$0xff]  }
 0x353   :  { %2363 = vmatpush1.bf16.msra.mxu1 %v3317_v58  ;;  %v3388_v58 = vld [vmem:[#allocation13 + $0x1cc] ss:$28 sps:$4 sm:$0xff]  }
 0x354   :  { %2364 = vmatprep.subr.bf16.mxu1 %v3325_v59  ;;  %v3383_v59 = vld [vmem:[#allocation13 + $0x1c0] ss:$28 sps:$4 sm:$0xff]  }
 0x357   :  { %2365 = vmatpush1.bf16.msra.mxu1 %v3323_v60  ;;  %v3386_v60 = vld [vmem:[#allocation13 + $0x1c8] ss:$28 sps:$4 sm:$0xff]  }
 0x358   :  { %2366 = vmatprep.subr.bf16.mxu1 %v3331_v61  ;;  %v3391_v61 = vld [vmem:[#allocation13 + $0x19c] ss:$28 sps:$4 sm:$0xff]  }
 0x35b   :  { %2367 = vmatpush1.bf16.msra.mxu1 %v3329_v62  ;;  %v3392_v62 = vld [vmem:[#allocation13 + $0x360] ss:$28 sps:$4 sm:$0xff]  }
 0x35c   :  { %2368 = vmatprep.subr.bf16.mxu1 %v3337_v63  ;;  %v1472_v63 = vld [vmem:[%s3889_s10] sm:$0x3] }
 0x35f   :  { %2369 = vmatpush1.bf16.msra.mxu1 %v3335_v0 }
 0x360   :  { %2370 = vmatprep.subr.bf16.mxu1 %v3343_v1  ;;  %v1481_v1 = vrot.slane %v1472_v63, %v3814_v19 }
 0x363   :  { %2371 = vmatpush2.bf16.msra.mxu1 %v3341_v2  ;;  %v1477_v2 = vrot.slane %v1472_v63, %v3820_v21  ;;  %v3452_v63 = vld [vmem:[#allocation13 + $0x1d4] ss:$28 sps:$4 sm:$0xff]  }
 0x364   :  { %2372 = vmatprep.subr.bf16.mxu1 %v3349_v3 }
 0x367   :  { %2373 = vmatpush2.bf16.msra.mxu1 %v3347_v4 }
 0x368   :  { %2374 = vmatprep.subr.bf16.mxu1 %v3355_v5 }
 0x36b   :  { %2375 = vmatpush2.bf16.msra.mxu1 %v3353_v6 }
 0x36c   :  { %2376 = vmatprep.subr.bf16.mxu1 %v3361_v7 }
 0x36f   :  { %2377 = vmatpush2.bf16.msra.mxu1 %v3359_v8 }
 0x370   :  { %2378 = vmatprep.subr.bf16.mxu1 %v3367_v10 }
 0x373   :  { %2379 = vmatpush2.bf16.msra.mxu1 %v3365_v11 }
 0x374   :  { %2380 = vmatprep.subr.bf16.mxu1 %v3373_v49  ;;  %v3431_v49 = vld [vmem:[#allocation13 + $0x35c] ss:$28 sps:$4 sm:$0xff]  }
 0x377   :  { %2381 = vmatpush2.bf16.msra.mxu1 %v3371_v51  ;;  %v3434_v51 = vld [vmem:[#allocation13 + $0x324] ss:$28 sps:$4 sm:$0xff]  }
 0x378   :  { %2382 = vmatprep.subr.bf16.mxu1 %v3379_v53  ;;  %v3437_v53 = vld [vmem:[#allocation13 + $0x2ec] ss:$28 sps:$4 sm:$0xff]  }
 0x37b   :  { %2383 = vmatpush2.bf16.msra.mxu1 %v3377_v55  ;;  %v3440_v55 = vld [vmem:[#allocation13 + $0x2b4] ss:$28 sps:$4 sm:$0xff]  }
 0x37c   :  { %2384 = vmatprep.subr.bf16.mxu1 %v3385_v57  ;;  %v3443_v57 = vld [vmem:[#allocation13 + $0x27c] ss:$28 sps:$4 sm:$0xff]  }
 0x37f   :  { %2385 = vmatpush2.bf16.msra.mxu1 %v3383_v59  ;;  %v3446_v59 = vld [vmem:[#allocation13 + $0x244] ss:$28 sps:$4 sm:$0xff]  }
 0x380   :  { %2440 = vmatprep.subr.bf16.mxu1 %v3391_v61  ;;  %v3449_v61 = vld [vmem:[#allocation13 + $0x20c] ss:$28 sps:$4 sm:$0xff]  }
 0x402   :  { %v1446_v14 = vpop.f32.mrf.mxu1 }
 0x403   :  { %v1447_v17 = vadd.f32 %v2787_v12, %v1446_v14 }
 0x404   :  { %v3038_v15 = vpop.f32.mrf.mxu1 }
 0x405   :  { %v1453_v23 = vmax.f32 %v1447_v17, 0.0 }
 0x406   :  { %v1449_v18 = vpop.f32.mrf.mxu1 }
 0x407   :  { %v1450_v20 = vadd.f32 %v2787_v12, %v1449_v18  ;;  %v3389_v18 = vld [vmem:[#allocation13 + $0x198] ss:$28 sps:$4 sm:$0xff]  }
 0x408   :  { %v3039_v22 = vpop.f32.mrf.mxu1 }
 0x409   :  { %v1454_v24 = vmax.f32 %v1450_v20, 0.0  ;;  %v3393_v20 = vld [vmem:[#allocation13 + $0x1a0] ss:$28 sps:$4 sm:$0xff]  }
 0x40b   :  { %v1455_v26 = vpack.c.bf16 %v1454_v24, %v1453_v23  ;;  %v3396_v23 = vld [vmem:[#allocation13 + $0x164] ss:$28 sps:$4 sm:$0xff]  }
 0x40c   :  { %v3397_v24 = vld [vmem:[#allocation13 + $0x328] ss:$28 sps:$4 sm:$0xff]  }
 0x40d   :  { %1597 = vmatmul.mubr.bf16.vlgmr.msra.gmra.mxu0 %v1455_v26  ;;  %v3398_v26 = vld [vmem:[#allocation13 + $0x168] ss:$28 sps:$4 sm:$0xff]  }
 0x40e   :  { %2398 = vmatpush1.bf16.msra.mxu0 %v3296_v25  ;;  %v3394_v25 = vld [vmem:[#allocation13 + $0x160] ss:$28 sps:$4 sm:$0xff]  }
 0x40f   :  { %2399 = vmatprep.subr.bf16.mxu0 %v3304_v27  ;;  %v3401_v27 = vld [vmem:[#allocation13 + $0x12c] ss:$28 sps:$4 sm:$0xff]  }
 0x412   :  { %2400 = vmatpush1.bf16.msra.mxu0 %v3302_v28  ;;  %v3402_v28 = vld [vmem:[#allocation13 + $0x2f0] ss:$28 sps:$4 sm:$0xff]  }
 0x413   :  { %2401 = vmatprep.subr.bf16.mxu0 %v3310_v13  ;;  %v3399_v13 = vld [vmem:[#allocation13 + $0x128] ss:$28 sps:$4 sm:$0xff]  }
 0x416   :  { %2402 = vmatpush1.bf16.msra.mxu0 %v3308_v29  ;;  %v3403_v29 = vld [vmem:[#allocation13 + $0x130] ss:$28 sps:$4 sm:$0xff]  }
 0x417   :  { %2403 = vmatprep.subr.bf16.mxu0 %v3316_v30  ;;  %v3406_v30 = vld [vmem:[#allocation13 + $0xf4] ss:$28 sps:$4 sm:$0xff]  }
 0x41a   :  { %2404 = vmatpush1.bf16.msra.mxu0 %v3314_v31  ;;  %v3407_v31 = vld [vmem:[#allocation13 + $0x2b8] ss:$28 sps:$4 sm:$0xff]  }
 0x41b   :  { %2405 = vmatprep.subr.bf16.mxu0 %v3322_v9  ;;  %v3404_v9 = vld [vmem:[#allocation13 + $0xf0] ss:$28 sps:$4 sm:$0xff]  }
 0x41e   :  { %2406 = vmatpush1.bf16.msra.mxu0 %v3320_v32  ;;  %v3408_v32 = vld [vmem:[#allocation13 + $0xf8] ss:$28 sps:$4 sm:$0xff]  }
 0x41f   :  { %2407 = vmatprep.subr.bf16.mxu0 %v3328_v33  ;;  %v3411_v33 = vld [vmem:[#allocation13 + $0xbc] ss:$28 sps:$4 sm:$0xff]  }
 0x422   :  { %2408 = vmatpush1.bf16.msra.mxu0 %v3326_v34  ;;  %v3412_v34 = vld [vmem:[#allocation13 + $0x280] ss:$28 sps:$4 sm:$0xff]  }
 0x423   :  { %2409 = vmatprep.subr.bf16.mxu0 %v3334_v35  ;;  %v3409_v35 = vld [vmem:[#allocation13 + $0xb8] ss:$28 sps:$4 sm:$0xff]  }
 0x426   :  { %2410 = vmatpush1.bf16.msra.mxu0 %v3332_v36  ;;  %v3413_v36 = vld [vmem:[#allocation13 + $0xc0] ss:$28 sps:$4 sm:$0xff]  }
 0x427   :  { %2411 = vmatprep.subr.bf16.mxu0 %v3340_v37  ;;  %v3416_v37 = vld [vmem:[#allocation13 + $0x84] ss:$28 sps:$4 sm:$0xff]  }
 0x42a   :  { %2412 = vmatpush1.bf16.msra.mxu0 %v3338_v38  ;;  %v3417_v38 = vld [vmem:[#allocation13 + $0x248] ss:$28 sps:$4 sm:$0xff]  }
 0x42b   :  { %2413 = vmatprep.subr.bf16.mxu0 %v3346_v39  ;;  %v3414_v39 = vld [vmem:[#allocation13 + $0x80] ss:$28 sps:$4 sm:$0xff]  }
 0x42e   :  { %2414 = vmatpush2.bf16.msra.mxu0 %v3344_v40  ;;  %v3418_v40 = vld [vmem:[#allocation13 + $0x88] ss:$28 sps:$4 sm:$0xff]  }
 0x42f   :  { %2415 = vmatprep.subr.bf16.mxu0 %v3352_v41  ;;  %v3421_v41 = vld [vmem:[#allocation13 + $0x4c] ss:$28 sps:$4 sm:$0xff]  }
 0x432   :  { %2416 = vmatpush2.bf16.msra.mxu0 %v3350_v42  ;;  %v3422_v42 = vld [vmem:[#allocation13 + $0x210] ss:$28 sps:$4 sm:$0xff]  }
 0x433   :  { %2417 = vmatprep.subr.bf16.mxu0 %v3358_v43  ;;  %v3419_v43 = vld [vmem:[#allocation13 + $0x48] ss:$28 sps:$4 sm:$0xff]  }
 0x436   :  { %2418 = vmatpush2.bf16.msra.mxu0 %v3356_v44  ;;  %v3423_v44 = vld [vmem:[#allocation13 + $0x50] ss:$28 sps:$4 sm:$0xff]  }
 0x437   :  { %2419 = vmatprep.subr.bf16.mxu0 %v3364_v45  ;;  %v3426_v45 = vld [vmem:[#allocation13 + $0x14] ss:$28 sps:$4 sm:$0xff]  }
 0x43a   :  { %2420 = vmatpush2.bf16.msra.mxu0 %v3362_v46  ;;  %v3427_v46 = vld [vmem:[#allocation13 + $0x1d8] ss:$28 sps:$4 sm:$0xff]  }
 0x43b   :  { %2421 = vmatprep.subr.bf16.mxu0 %v3370_v47  ;;  %v3424_v47 = vld [vmem:[#allocation13 + $0x10] ss:$28 sps:$4 sm:$0xff]  }
 0x43e   :  { %2422 = vmatpush2.bf16.msra.mxu0 %v3368_v48  ;;  %v3428_v48 = vld [vmem:[#allocation13 + $0x18] ss:$28 sps:$4 sm:$0xff]  }
 0x43f   :  { %2423 = vmatprep.subr.bf16.mxu0 %v3376_v50  ;;  %v3429_v50 = vld [vmem:[#allocation13 + $0x358] ss:$28 sps:$4 sm:$0xff]  }
 0x442   :  { %2424 = vmatpush2.bf16.msra.mxu0 %v3374_v52  ;;  %v3432_v52 = vld [vmem:[#allocation13 + $0x320] ss:$28 sps:$4 sm:$0xff]  }
 0x443   :  { %2425 = vmatprep.subr.bf16.mxu0 %v3382_v54  ;;  %v3435_v54 = vld [vmem:[#allocation13 + $0x2e8] ss:$28 sps:$4 sm:$0xff]  }
 0x446   :  { %2426 = vmatpush2.bf16.msra.mxu0 %v3380_v56  ;;  %v3438_v56 = vld [vmem:[#allocation13 + $0x2b0] ss:$28 sps:$4 sm:$0xff]  }
 0x447   :  { %2427 = vmatprep.subr.bf16.mxu0 %v3388_v58  ;;  %v3441_v58 = vld [vmem:[#allocation13 + $0x278] ss:$28 sps:$4 sm:$0xff]  }
 0x44a   :  { %2428 = vmatpush2.bf16.msra.mxu0 %v3386_v60  ;;  %v3444_v60 = vld [vmem:[#allocation13 + $0x240] ss:$28 sps:$4 sm:$0xff]  }
 0x44b   :  { %2978 = vmatprep.subr.bf16.mxu0 %v3392_v62  ;;  %v3447_v62 = vld [vmem:[#allocation13 + $0x208] ss:$28 sps:$4 sm:$0xff]  }
 0x4cd   :  { %v1598_v0 = vpop.f32.mrf.mxu0 }
 0x4ce   :  { %v1599_v7 = vadd.f32 %v1598_v0, %v1477_v2  ;;  %v3450_v0 = vld [vmem:[#allocation13 + $0x1d0] ss:$28 sps:$4 sm:$0xff]  }
 0x4cf   :  { %v1600_v3 = vpop.f32.mrf.mxu0 }
 0x4d0   :  { %v1601_v5 = vadd.f32 %v1600_v3, %v1481_v1  ;;  %v1607_v15 = vmax.f32 %v1599_v7, 0.0  ;;  %v1757_v3 = vsub.s32 3, %v3811_v16 }
 0x4d1   :  { %v1602_v4 = vpop.f32.mrf.mxu0 }
 0x4d2   :  { %v1603_v6 = vadd.f32 %v1602_v4, %v1477_v2  ;;  %v1608_v12 = vmax.f32 %v1601_v5, 0.0  ;;  %v3861_v2 = vld [vmem:[%s3891_s12] sm:$0xff]  ;;  %s3695_s12 = smov [#allocation14]  }
 0x4d3   :  { %v1604_v8 = vpop.f32.mrf.mxu0  ;;  %v1746_v4 = vrot.slane %v3861_v2, %v3820_v21  ;;  %v1758_v7 = vrot.slane %v3861_v2, %v1757_v3  ;;  %s2627_s15 = sshll.u32 %s3695_s12, 4  ;;  %s2628_s15 = int_to_ptr.vmem [resolvable:$true] %s2627_s15 }
 0x4d4   :  { %v1605_v10 = vadd.f32 %v1604_v8, %v1481_v1  ;;  %v1609_v11 = vmax.f32 %v1603_v6, 0.0  ;;  %v1753_v1 = vsub.s32 2, %v3811_v16  ;;  %v1750_v6 = vrot.slane %v3861_v2, %v3814_v19  ;;  %s3649_s16 = scalar_lea.vmem %s2628_s15, 1792  ;;  %p3654_p8 = scmp.lt.s32.totalorder %s2628_s15, %s2628_s15 }
 0x4d5   :  { %p3650_p7 = scmp.ne.s32.totalorder %s2628_s15, %s3649_s16  ;;  %p3655_p9 = scmp.lt.s32.totalorder %s3649_s16, %s3649_s16 }
 0x4d6   :  { %v1610_v14 = vmax.f32 %v1605_v10, 0.0  ;;  %v3851_v22 = vpack.c.bf16 %v1609_v11, %v1607_v15  ;;  %v1754_v5 = vrot.slane %v3861_v2, %v1753_v1 }
 0x4d7   :  { %p3656_p10 = por %p3655_p9, %p3654_p8 }
 0x4d8   :  { %v1612_v17 = vpack.c.bf16 %v1610_v14, %v1608_v12 }
 0x4d9   :  { %p3657_p11 = pnand %p3656_p10, %p3650_p7 }
 0x4da   :  { %2386 = vmatprep.mubr.bf16.mxu1 %v1612_v17  ;;  %2429 = vmatprep.mubr.bf16.mxu0 %v1612_v17 }
 0x4db   :  { %2387 = vmatmul.mubr.bf16.vlgmr.msra.gmra.mxu1 %v3851_v22  ;;  %2430 = vmatmul.mubr.bf16.vlgmr.msra.gmra.mxu0 %v3851_v22 }
 0x4dc   :  { %2441 = vmatpush1.bf16.msra.mxu1 %v3389_v18  ;;  %2979 = vmatpush3.bf16.msra.mxu0 %v3393_v20 }
 0x4dd   :  { %2472 = vmatprep.mubr.bf16.mxu1 %v1612_v17  ;;  %2515 = vmatprep.mubr.bf16.mxu0 %v1612_v17 }
 0x4de   :  { %2442 = vmatprep.subr.bf16.mxu1 %v3396_v23  ;;  %2980 = vmatprep.subr.bf16.mxu0 %v3397_v24 }
 0x4e0   :  { %2443 = vmatpush1.bf16.msra.mxu1 %v3394_v25  ;;  %2981 = vmatpush3.bf16.msra.mxu0 %v3398_v26 }
 0x4e1   :  { %2444 = vmatprep.subr.bf16.mxu1 %v3401_v27  ;;  %2982 = vmatprep.subr.bf16.mxu0 %v3402_v28 }
 0x4e4   :  { %2445 = vmatpush1.bf16.msra.mxu1 %v3399_v13  ;;  %2983 = vmatpush3.bf16.msra.mxu0 %v3403_v29 }
 0x4e5   :  { %2446 = vmatprep.subr.bf16.mxu1 %v3406_v30  ;;  %2984 = vmatprep.subr.bf16.mxu0 %v3407_v31 }
 0x4e8   :  { %2447 = vmatpush1.bf16.msra.mxu1 %v3404_v9  ;;  %2985 = vmatpush3.bf16.msra.mxu0 %v3408_v32 }
 0x4e9   :  { %2448 = vmatprep.subr.bf16.mxu1 %v3411_v33  ;;  %2986 = vmatprep.subr.bf16.mxu0 %v3412_v34 }
 0x4ec   :  { %2449 = vmatpush1.bf16.msra.mxu1 %v3409_v35  ;;  %2987 = vmatpush3.bf16.msra.mxu0 %v3413_v36 }
 0x4ed   :  { %2450 = vmatprep.subr.bf16.mxu1 %v3416_v37  ;;  %2988 = vmatprep.subr.bf16.mxu0 %v3417_v38 }
 0x4f0   :  { %2451 = vmatpush1.bf16.msra.mxu1 %v3414_v39  ;;  %2989 = vmatpush3.bf16.msra.mxu0 %v3418_v40 }
 0x4f1   :  { %2452 = vmatprep.subr.bf16.mxu1 %v3421_v41  ;;  %2990 = vmatprep.subr.bf16.mxu0 %v3422_v42 }
 0x4f4   :  { %2453 = vmatpush1.bf16.msra.mxu1 %v3419_v43  ;;  %2991 = vmatpush3.bf16.msra.mxu0 %v3423_v44 }
 0x4f5   :  { %2454 = vmatprep.subr.bf16.mxu1 %v3426_v45  ;;  %2992 = vmatprep.subr.bf16.mxu0 %v3427_v46 }
 0x4f8   :  { %2455 = vmatpush1.bf16.msra.mxu1 %v3424_v47  ;;  %2993 = vmatpush3.bf16.msra.mxu0 %v3428_v48 }
 0x4f9   :  { %2456 = vmatprep.subr.bf16.mxu1 %v3431_v49  ;;  %v1769_v49 = vsub.s32 6, %v3811_v16 }
 0x4fb   :  { %2516 = vmatmul.mubr.bf16.vlgmr.msra.gmra.mxu0 %v3851_v22 }
 0x4fc   :  { %2457 = vmatpush2.bf16.msra.mxu1 %v3429_v50 }
 0x4fd   :  { %2458 = vmatprep.subr.bf16.mxu1 %v3434_v51  ;;  %v1770_v51 = vrot.slane %v3861_v2, %v1769_v49 }
 0x500   :  { %2459 = vmatpush2.bf16.msra.mxu1 %v3432_v52 }
 0x501   :  { %2460 = vmatprep.subr.bf16.mxu1 %v3437_v53 }
 0x504   :  { %2461 = vmatpush2.bf16.msra.mxu1 %v3435_v54 }
 0x505   :  { %2462 = vmatprep.subr.bf16.mxu1 %v3440_v55 }
 0x508   :  { %2463 = vmatpush2.bf16.msra.mxu1 %v3438_v56 }
 0x509   :  { %2464 = vmatprep.subr.bf16.mxu1 %v3443_v57 }
 0x50c   :  { %2465 = vmatpush2.bf16.msra.mxu1 %v3441_v58 }
 0x50d   :  { %2466 = vmatprep.subr.bf16.mxu1 %v3446_v59 }
 0x510   :  { %2467 = vmatpush2.bf16.msra.mxu1 %v3444_v60 }
 0x511   :  { %2468 = vmatprep.subr.bf16.mxu1 %v3449_v61 }
 0x514   :  { %2469 = vmatpush2.bf16.msra.mxu1 %v3447_v62 }
 0x515   :  { %2470 = vmatprep.subr.bf16.mxu1 %v3452_v63 }
 0x518   :  { %2471 = vmatpush2.bf16.msra.mxu1 %v3450_v0 }
 0x51b   :  { %2473 = vmatmul.mubr.bf16.vlgmr.msra.gmra.mxu1 %v3851_v22 }
 0x59b   :  { %v2388_v8 = vpop.f32.mrf.mxu1  ;;  %v2431_v10 = vpop.f32.mrf.mxu0 }
 0x59c   :  { %v2389_v11 = vadd.f32 %v2388_v8, %v1746_v4  ;;  %v2432_v12 = vadd.f32 %v2431_v10, %v1754_v5  ;;  %v1761_v8 = vsub.s32 4, %v3811_v16 }
 0x59d   :  { %v2390_v14 = vpop.f32.mrf.mxu1  ;;  %v2433_v15 = vpop.f32.mrf.mxu0 }
 0x59e   :  { %v2924_v17 = vmul.f32 -1.442695, %v2389_v11  ;;  %v2926_v18 = vmul.f32 -1.442695, %v2432_v12  ;;  %v2391_v20 = vadd.f32 %v2390_v14, %v1750_v6  ;;  %v2434_v22 = vadd.f32 %v2433_v15, %v1758_v7 }
 0x59f   :  { %v2392_v23 = vpop.f32.mrf.mxu1  ;;  %v2435_v24 = vpop.f32.mrf.mxu0  ;;  %v1765_v12 = vsub.s32 5, %v3811_v16  ;;  %v1762_v14 = vrot.slane %v3861_v2, %v1761_v8 }
 0x5a0   :  { %3453 = vpow2.f32 %v2924_v17  ;;  %v2925_v21 = vmul.f32 -1.442695, %v2391_v20  ;;  %v2927_v25 = vmul.f32 -1.442695, %v2434_v22  ;;  %v2393_v26 = vadd.f32 %v2392_v23, %v1746_v4 }
 0x5a1   :  { %3455 = vpow2.f32 %v2926_v18  ;;  %v2436_v19 = vadd.f32 %v2435_v24, %v1754_v5  ;;  %v2394_v27 = vpop.f32.mrf.mxu1  ;;  %v2437_v28 = vpop.f32.mrf.mxu0  ;;  %v1766_v15 = vrot.slane %v3861_v2, %v1765_v12 }
 0x5a2   :  { %3457 = vpow2.f32 %v2925_v21  ;;  %v2931_v13 = vmul.f32 -1.442695, %v2393_v26  ;;  %v2395_v29 = vadd.f32 %v2394_v27, %v1750_v6  ;;  %v2438_v30 = vadd.f32 %v2437_v28, %v1758_v7 }
 0x5a3   :  { %3459 = vpow2.f32 %v2927_v25  ;;  %v2933_v31 = vmul.f32 -1.442695, %v2436_v19 }
 0x5a4   :  { %3461 = vpow2.f32 %v2931_v13  ;;  %v2932_v9 = vmul.f32 -1.442695, %v2395_v29  ;;  %v2934_v32 = vmul.f32 -1.442695, %v2438_v30 }
 0x5a5   :  { %3463 = vpow2.f32 %v2933_v31 }
 0x5a6   :  { %3465 = vpow2.f32 %v2932_v9 }
 0x5a7   :  { %3467 = vpow2.f32 %v2934_v32 }
 0x5ad   :  { %v3454_v33 = vpop.eup %3453 }
 0x5ae   :  { %v3456_v34 = vpop.eup %3455  ;;  %v2566_v35 = vadd.f32 1.0, %v3454_v33 }
 0x5af   :  { %v3458_v36 = vpop.eup %3457  ;;  %v2568_v37 = vadd.f32 1.0, %v3456_v34 }
 0x5b0   :  { %v3460_v38 = vpop.eup %3459  ;;  %3469 = vrcp.f32 %v2566_v35  ;;  %v2567_v39 = vadd.f32 1.0, %v3458_v36 }
 0x5b1   :  { %v3462_v40 = vpop.eup %3461  ;;  %3471 = vrcp.f32 %v2568_v37  ;;  %v2569_v41 = vadd.f32 1.0, %v3460_v38 }
 0x5b2   :  { %v3464_v42 = vpop.eup %3463  ;;  %3473 = vrcp.f32 %v2567_v39  ;;  %v2573_v43 = vadd.f32 1.0, %v3462_v40 }
 0x5b3   :  { %v3466_v44 = vpop.eup %3465  ;;  %3475 = vrcp.f32 %v2569_v41  ;;  %v2575_v45 = vadd.f32 1.0, %v3464_v42 }
 0x5b4   :  { %v3468_v46 = vpop.eup %3467  ;;  %3477 = vrcp.f32 %v2573_v43  ;;  %v2574_v47 = vadd.f32 1.0, %v3466_v44 }
 0x5b5   :  { %3479 = vrcp.f32 %v2575_v45  ;;  %v2576_v48 = vadd.f32 1.0, %v3468_v46 }
 0x5b6   :  { %3481 = vrcp.f32 %v2574_v47 }
 0x5b7   :  { %3483 = vrcp.f32 %v2576_v48 }
 0x5bb   :  { %v2994_v50 = vpop.f32.mrf.mxu0 }
 0x5bd   :  { %v3470_v52 = vpop.eup %3469  ;;  %v2995_v53 = vpop.f32.mrf.mxu0 }
 0x5be   :  { %v3472_v54 = vpop.eup %3471  ;;  %2608 = vst [vmem:[#allocation14] sm:$0xff] %v3470_v52  ;;  %v2996_v55 = vadd.f32 %v2995_v53, %v2994_v50 }
 0x5bf   :  { %v3474_v56 = vpop.eup %3473  ;;  %2610 = vst [vmem:[#allocation14 + $0x10] sm:$0xff] %v3472_v54  ;;  %v2997_v57 = vpop.f32.mrf.mxu0 }
 0x5c0   :  { %v3476_v58 = vpop.eup %3475  ;;  %2609 = vst [vmem:[#allocation14 + $0x8] sm:$0xff] %v3474_v56  ;;  %v2518_v59 = vadd.f32 %v2996_v55, %v1770_v51 }
 0x5c1   :  { %v3478_v60 = vpop.eup %3477  ;;  %2611 = vst [vmem:[#allocation14 + $0x18] sm:$0xff] %v3476_v58  ;;  %v2998_v61 = vpop.f32.mrf.mxu0 }
 0x5c2   :  { %v3480_v62 = vpop.eup %3479  ;;  %2615 = vst [vmem:[#allocation14 + $0x38] sm:$0xff] %v3478_v60  ;;  %v2930_v63 = vmul.f32 -1.442695, %v2518_v59  ;;  %v2999_v0 = vadd.f32 %v2998_v61, %v2997_v57 }
 0x5c3   :  { %v3482_v1 = vpop.eup %3481  ;;  %2617 = vst [vmem:[#allocation14 + $0x48] sm:$0xff] %v3480_v62 }
 0x5c4   :  { %v3484_v3 = vpop.eup %3483  ;;  %2616 = vst [vmem:[#allocation14 + $0x40] sm:$0xff] %v3482_v1  ;;  %3485 = vpow2.f32 %v2930_v63  ;;  %v2521_v4 = vadd.f32 %v2999_v0, %v1770_v51 }
 0x5c5   :  { %2618 = vst [vmem:[#allocation14 + $0x50] sm:$0xff] %v3484_v3 }
 0x5c6   :  { %v2937_v5 = vmul.f32 -1.442695, %v2521_v4 }
 0x5c8   :  { %3487 = vpow2.f32 %v2937_v5 }
 0x5d1   :  { %v3486_v6 = vpop.eup %3485 }
 0x5d2   :  { %v2572_v7 = vadd.f32 1.0, %v3486_v6 }
 0x5d4   :  { %3489 = vrcp.f32 %v2572_v7 }
 0x5d5   :  { %v3488_v10 = vpop.eup %3487 }
 0x5d6   :  { %v2579_v11 = vadd.f32 1.0, %v3488_v10 }
 0x5d8   :  { %3491 = vrcp.f32 %v2579_v11 }
 0x5db   :  { %v2474_v17 = vpop.f32.mrf.mxu1 }
 0x5dc   :  { %v2475_v18 = vadd.f32 %v2474_v17, %v1762_v14 }
 0x5dd   :  { %v2476_v20 = vpop.f32.mrf.mxu1 }
 0x5de   :  { %v2928_v22 = vmul.f32 -1.442695, %v2475_v18  ;;  %v2477_v23 = vadd.f32 %v2476_v20, %v1766_v15 }
 0x5df   :  { %v2478_v24 = vpop.f32.mrf.mxu1 }
 0x5e0   :  { %3493 = vpow2.f32 %v2928_v22  ;;  %v2929_v21 = vmul.f32 -1.442695, %v2477_v23  ;;  %v2479_v25 = vadd.f32 %v2478_v24, %v1762_v14 }
 0x5e1   :  { %v3490_v26 = vpop.eup %3489  ;;  %v2480_v19 = vpop.f32.mrf.mxu1 }
 0x5e2   :  { %2614 = vst [vmem:[#allocation14 + $0x30] sm:$0xff] %v3490_v26  ;;  %3495 = vpow2.f32 %v2929_v21  ;;  %v2935_v27 = vmul.f32 -1.442695, %v2479_v25  ;;  %v2481_v16 = vadd.f32 %v2480_v19, %v1766_v15 }
 0x5e4   :  { %3497 = vpow2.f32 %v2935_v27  ;;  %v2936_v28 = vmul.f32 -1.442695, %v2481_v16 }
 0x5e5   :  { %v3492_v13 = vpop.eup %3491 }
 0x5e6   :  { %2621 = vst [vmem:[#allocation14 + $0x68] sm:$0xff] %v3492_v13  ;;  %3499 = vpow2.f32 %v2936_v28 }
 0x5ed   :  { %v3494_v2 = vpop.eup %3493 }
 0x5ee   :  { %v2570_v29 = vadd.f32 1.0, %v3494_v2 }
 0x5ef   :  { %v3496_v30 = vpop.eup %3495 }
 0x5f0   :  { %3501 = vrcp.f32 %v2570_v29  ;;  %v2571_v31 = vadd.f32 1.0, %v3496_v30 }
 0x5f1   :  { %v3498_v9 = vpop.eup %3497 }
 0x5f2   :  { %3503 = vrcp.f32 %v2571_v31  ;;  %v2577_v32 = vadd.f32 1.0, %v3498_v9 }
 0x5f3   :  { %v3500_v33 = vpop.eup %3499 }
 0x5f4   :  { %3505 = vrcp.f32 %v2577_v32  ;;  %v2578_v34 = vadd.f32 1.0, %v3500_v33 }
 0x5f6   :  { %3507 = vrcp.f32 %v2578_v34 }
 0x5fd   :  { %v3502_v35 = vpop.eup %3501 }
 0x5fe   :  { %2612 = vst [vmem:[#allocation14 + $0x20] sm:$0xff] %v3502_v35 }
 0x5ff   :  { %v3504_v36 = vpop.eup %3503 }
 0x600   :  { %2613 = vst [vmem:[#allocation14 + $0x28] sm:$0xff] %v3504_v36 }
 0x601   :  { %v3506_v37 = vpop.eup %3505 }
 0x602   :  { %2619 = vst [vmem:[#allocation14 + $0x58] sm:$0xff] %v3506_v37 }
 0x603   :  { %v3508_v38 = vpop.eup %3507 }
 0x604   :  { %2620 = vst [vmem:[#allocation14 + $0x60] sm:$0xff] %v3508_v38 }
 0x605   :  { %3660 = shalt.err (!%p3657_p11)
}
 0x606   :  { %s3696_s9 = smov 896   ;;  %s3697_s28 = smov 56  }
 0x607   :  { %2633 = dma.vmem_to_hbm [thread:$0]  %s2628_s15, 1792, %s3892_s13, [#allocation4], %s3696_s9, %s3696_s9, %s3697_s28  }
 0x608   :  { %3677 = dma.done.wait [#allocation4], 1792  }
 0x609   :  { %3678 = vsyncadd [#allocation4], 4294965504 }
 0x60a   :  { %2637 = vsyncpa [#allocation3], 1 }
 0x60b   :  { %2638 = vsyncpa [#allocation6], 1 }
 0x60c   :  { %2639 = vsyncpa [#allocation9], 1 }
 0x60d   :  { %2640 = vsyncpa [#allocation12], 1 }
 0x60e   :  { %2641 = vsyncpa [#allocation4], 1 }

</bundles_post_ra>
